<compile_context>
chip_gen: v5e
topology: v5e:2x2
jax: 0.10.0
libtpu: 0.0.40
codegen_flags: <defaults>
</compile_context>

<pallas_src>
import jax
import jax.numpy as jnp
from jax.experimental import pallas as pl
from jax.experimental.pallas import tpu as pltpu


def actor_kernel(x_ref, w1_ref, b1_ref, w2_ref, b2_ref, w3_ref, b3_ref, o_ref):
    x = x_ref[...]
    # fc1 + relu (dot operands may be bf16 weights; accumulation stays f32)
    h1 = jnp.dot(x.astype(w1_ref.dtype), w1_ref[...],
                 preferred_element_type=jnp.float32)
    h1 = jnp.maximum(h1 + b1_ref[...], 0.0)
    # fc2 + relu
    h2 = jnp.dot(h1.astype(w2_ref.dtype), w2_ref[...],
                 preferred_element_type=jnp.float32)
    h2 = jnp.maximum(h2 + b2_ref[...], 0.0)
    # fc3 + tanh — store only the real action_dim columns (no lane padding of
    # the output stream; the masked vst is cheap since the store slot is far
    # from saturated at this width).
    h3 = jnp.dot(h2.astype(w3_ref.dtype), w3_ref[...],
                 preferred_element_type=jnp.float32)
    o_ref[...] = jnp.tanh(h3 + b3_ref[...]).astype(o_ref.dtype)


def prepare_actor_params(torch_params, matmul_dtype=jnp.float32):
    """One-time conversion (do this when params are created/updated, NOT per
    forward) from PyTorch convention (weight (out, in), bias (out,)) to the
    kernel layout: weight (in, out) in `matmul_dtype`, bias (1, out) in f32.

    Use matmul_dtype=jnp.bfloat16 on v6e/v7x for ~2-3x MXU throughput and half
    the weight bytes (loosen any f32 parity check to ~1e-2)."""
    def w(name):
        return jnp.asarray(torch_params[name], jnp.float32).T.astype(matmul_dtype)

    def b(name):
        return jnp.asarray(torch_params[name], jnp.float32)[None, :]

    return {
        "w1": w("w1"), "b1": b("b1"),
        "w2": w("w2"), "b2": b("b2"),
        "w3": w("w3"), "b3": b("b3"),
    }


def actor_forward(state, kparams, *, tile_b=None):
    """state: (B, state_dim) f32.  kparams: output of prepare_actor_params."""
    B, state_dim = state.shape
    w1, b1 = kparams["w1"], kparams["b1"]
    w2, b2 = kparams["w2"], kparams["b2"]
    w3, b3 = kparams["w3"], kparams["b3"]
    h1_dim = w1.shape[1]
    h2_dim = w2.shape[1]
    action_dim = w3.shape[1]  # static (from shape), safe for out_shape

    # Adaptive batch tile: single grid step up to 2048 rows (per-tile VMEM is
    # ~1.2 KB/row, so even 2048 rows is <3 MB — well under every chip's
    # scoped VMEM default), rounded up to a multiple of 8 sublanes.
    if tile_b is None:
        tile_b = B if B <= 2048 else 2048
    tile_b = max(8, min(tile_b, B))
    tile_b = ((tile_b + 7) // 8) * 8
    nb = pl.cdiv(B, tile_b)  # partial last block is clipped by Pallas

    flops = 2 * B * (state_dim * h1_dim + h1_dim * h2_dim + h2_dim * action_dim)
    transcendentals = B * action_dim  # tanh
    param_bytes = sum(int(a.size) * a.dtype.itemsize
                      for a in (w1, b1, w2, b2, w3, b3))
    bytes_accessed = (int(state.size) * state.dtype.itemsize
                      + param_bytes + B * action_dim * 4)

    out = pl.pallas_call(
        actor_kernel,
        out_shape=jax.ShapeDtypeStruct((B, action_dim), jnp.float32),
        grid=(nb,),
        in_specs=[
            # streamed batch tile (double-buffered by BlockSpec)
            pl.BlockSpec((tile_b, state_dim), lambda i: (i, 0)),
            # VMEM-resident weights/biases (same block every step)
            pl.BlockSpec((state_dim, h1_dim), lambda i: (0, 0)),
            pl.BlockSpec((1, h1_dim), lambda i: (0, 0)),
            pl.BlockSpec((h1_dim, h2_dim), lambda i: (0, 0)),
            pl.BlockSpec((1, h2_dim), lambda i: (0, 0)),
            pl.BlockSpec((h2_dim, action_dim), lambda i: (0, 0)),
            pl.BlockSpec((1, action_dim), lambda i: (0, 0)),
        ],
        out_specs=pl.BlockSpec((tile_b, action_dim), lambda i: (i, 0)),
        compiler_params=pltpu.CompilerParams(
            dimension_semantics=("arbitrary",)),
        cost_estimate=pl.CostEstimate(
            flops=flops,
            transcendentals=transcendentals,
            bytes_accessed=bytes_accessed),
    )(state, w1, b1, w2, b2, w3, b3)

    return out


def init_actor_params(key, state_dim, action_dim, hidden_size1, hidden_size2):
    """Deterministic init mimicking nn.Linear default (uniform +-1/sqrt(fan_in)),
    stored in PyTorch convention (weight (out, in), bias (out,))."""
    ks = jax.random.split(key, 6)

    def linear(kw, kb, fan_in, fan_out):
        bound = 1.0 / jnp.sqrt(jnp.float32(fan_in))
        w = jax.random.uniform(kw, (fan_out, fan_in), jnp.float32, -bound, bound)
        b = jax.random.uniform(kb, (fan_out,), jnp.float32, -bound, bound)
        return w, b

    w1, b1 = linear(ks[0], ks[1], state_dim, hidden_size1)
    w2, b2 = linear(ks[2], ks[3], hidden_size1, hidden_size2)
    w3, b3 = linear(ks[4], ks[5], hidden_size2, action_dim)
    return {"w1": w1, "b1": b1, "w2": w2, "b2": b2, "w3": w3, "b3": b3}


if __name__ == "__main__":
    key = jax.random.PRNGKey(0)
    k_state, k_params = jax.random.split(key)

    batch = 512
    state_dim = 16
    action_dim = 4
    hidden_size1 = 64
    hidden_size2 = 64

    state = jax.random.normal(k_state, (batch, state_dim), jnp.float32)
    torch_params = init_actor_params(k_params, state_dim, action_dim,
                                     hidden_size1, hidden_size2)

    # One-time layout conversion.  Keep f32 here so the 1e-5 parity check
    # against the reference holds; use matmul_dtype=jnp.bfloat16 in production
    # on v6e/v7x.
    kparams = prepare_actor_params(torch_params, matmul_dtype=jnp.float32)

    fwd = jax.jit(actor_forward)
    out = jax.block_until_ready(fwd(state, kparams))

    # Reference check in plain JAX (same math as the PyTorch module).
    h1 = jnp.maximum(state @ torch_params["w1"].T + torch_params["b1"], 0.0)
    h2 = jnp.maximum(h1 @ torch_params["w2"].T + torch_params["b2"], 0.0)
    ref = jnp.tanh(h2 @ torch_params["w3"].T + torch_params["b3"])

    assert out.shape == (batch, action_dim)
    assert jnp.allclose(out, ref, atol=1e-5, rtol=1e-5)

    print("KERNEL_OK")
</pallas_src>

<mosaic_0001>
module attributes {stable_mosaic.version = 11 : i64} {
  func.func @actor_kernel(%arg0: i32, %arg1: memref<512x16xf32, #tpu.memory_space<vmem>>, %arg2: memref<16x64xf32, #tpu.memory_space<vmem>>, %arg3: memref<1x64xf32, #tpu.memory_space<vmem>>, %arg4: memref<64x64xf32, #tpu.memory_space<vmem>>, %arg5: memref<1x64xf32, #tpu.memory_space<vmem>>, %arg6: memref<64x4xf32, #tpu.memory_space<vmem>>, %arg7: memref<1x4xf32, #tpu.memory_space<vmem>>, %arg8: memref<512x4xf32, #tpu.memory_space<vmem>>) attributes {dimension_semantics = [#tpu.dimension_semantics<arbitrary>], iteration_bounds = array<i64: 1>, scalar_prefetch = 0 : i64, scratch_operands = 0 : i64, tpu.core_type = #tpu.core_type<tc>, window_params = [{transform_indices = @transform_0, window_bounds = array<i64: 512, 16>}, {pipeline_mode = #tpu.pipeline_mode<synchronous>, transform_indices = @transform_1, window_bounds = array<i64: 16, 64>}, {pipeline_mode = #tpu.pipeline_mode<synchronous>, transform_indices = @transform_2, window_bounds = array<i64: 1, 64>}, {pipeline_mode = #tpu.pipeline_mode<synchronous>, transform_indices = @transform_3, window_bounds = array<i64: 64, 64>}, {pipeline_mode = #tpu.pipeline_mode<synchronous>, transform_indices = @transform_4, window_bounds = array<i64: 1, 64>}, {pipeline_mode = #tpu.pipeline_mode<synchronous>, transform_indices = @transform_5, window_bounds = array<i64: 64, 4>}, {pipeline_mode = #tpu.pipeline_mode<synchronous>, transform_indices = @transform_6, window_bounds = array<i64: 1, 4>}, {transform_indices = @transform_7, window_bounds = array<i64: 512, 4>}]} {
    %c0 = arith.constant 0 : index
    %c0_0 = arith.constant 0 : index
    %0 = vector.load %arg1[%c0, %c0_0] : memref<512x16xf32, #tpu.memory_space<vmem>>, vector<512x16xf32>
    %c0_1 = arith.constant 0 : index
    %c0_2 = arith.constant 0 : index
    %1 = vector.load %arg2[%c0_1, %c0_2] : memref<16x64xf32, #tpu.memory_space<vmem>>, vector<16x64xf32>
    %cst = arith.constant dense<0.000000e+00> : vector<512x64xf32>
    %2 = tpu.matmul %0, %1, %cst {dimension_numbers = #tpu.dot_dimension_numbers<[1], [0], [0], [1], [0, 0, 1, 1], [], []>} : vector<512x16xf32>, vector<16x64xf32>, vector<512x64xf32> -> vector<512x64xf32>
    %c0_3 = arith.constant 0 : index
    %c0_4 = arith.constant 0 : index
    %3 = vector.load %arg3[%c0_3, %c0_4] : memref<1x64xf32, #tpu.memory_space<vmem>>, vector<1x64xf32>
    %4 = vector.broadcast %3 : vector<1x64xf32> to vector<512x64xf32>
    %5 = arith.addf %2, %4 : vector<512x64xf32>
    %cst_5 = arith.constant 0.000000e+00 : f32
    %6 = vector.broadcast %cst_5 : f32 to vector<512x64xf32>
    %7 = arith.maximumf %5, %6 : vector<512x64xf32>
    %c0_6 = arith.constant 0 : index
    %c0_7 = arith.constant 0 : index
    %8 = vector.load %arg4[%c0_6, %c0_7] : memref<64x64xf32, #tpu.memory_space<vmem>>, vector<64x64xf32>
    %cst_8 = arith.constant dense<0.000000e+00> : vector<512x64xf32>
    %9 = tpu.matmul %7, %8, %cst_8 {dimension_numbers = #tpu.dot_dimension_numbers<[1], [0], [0], [1], [0, 0, 1, 1], [], []>} : vector<512x64xf32>, vector<64x64xf32>, vector<512x64xf32> -> vector<512x64xf32>
    %c0_9 = arith.constant 0 : index
    %c0_10 = arith.constant 0 : index
    %10 = vector.load %arg5[%c0_9, %c0_10] : memref<1x64xf32, #tpu.memory_space<vmem>>, vector<1x64xf32>
    %11 = vector.broadcast %10 : vector<1x64xf32> to vector<512x64xf32>
    %12 = arith.addf %9, %11 : vector<512x64xf32>
    %cst_11 = arith.constant 0.000000e+00 : f32
    %13 = vector.broadcast %cst_11 : f32 to vector<512x64xf32>
    %14 = arith.maximumf %12, %13 : vector<512x64xf32>
    %c0_12 = arith.constant 0 : index
    %c0_13 = arith.constant 0 : index
    %15 = vector.load %arg6[%c0_12, %c0_13] : memref<64x4xf32, #tpu.memory_space<vmem>>, vector<64x4xf32>
    %cst_14 = arith.constant dense<0.000000e+00> : vector<512x4xf32>
    %16 = tpu.matmul %14, %15, %cst_14 {dimension_numbers = #tpu.dot_dimension_numbers<[1], [0], [0], [1], [0, 0, 1, 1], [], []>} : vector<512x64xf32>, vector<64x4xf32>, vector<512x4xf32> -> vector<512x4xf32>
    %c0_15 = arith.constant 0 : index
    %c0_16 = arith.constant 0 : index
    %17 = vector.load %arg7[%c0_15, %c0_16] : memref<1x4xf32, #tpu.memory_space<vmem>>, vector<1x4xf32>
    %18 = vector.broadcast %17 : vector<1x4xf32> to vector<512x4xf32>
    %19 = arith.addf %16, %18 : vector<512x4xf32>
    %20 = math.tanh %19 : vector<512x4xf32>
    %c0_17 = arith.constant 0 : index
    %c0_18 = arith.constant 0 : index
    %21 = vector.load %arg8[%c0_17, %c0_18] : memref<512x4xf32, #tpu.memory_space<vmem>>, vector<512x4xf32>
    tpu.vector_store %arg8[%c0_17, %c0_18], %20 {strides = array<i32>} : memref<512x4xf32, #tpu.memory_space<vmem>>, vector<512x4xf32>,
    return
  }
  func.func @transform_0(%arg0: i32) -> (i32, i32) {
    %c0_i32 = arith.constant 0 : i32
    %c0_i32_0 = arith.constant 0 : i32
    return %arg0, %c0_i32 : i32, i32
  }
  func.func @transform_1(%arg0: i32) -> (i32, i32) {
    %c0_i32 = arith.constant 0 : i32
    %c0_i32_0 = arith.constant 0 : i32
    %c0_i32_1 = arith.constant 0 : i32
    return %c0_i32, %c0_i32_0 : i32, i32
  }
  func.func @transform_2(%arg0: i32) -> (i32, i32) {
    %c0_i32 = arith.constant 0 : i32
    %c0_i32_0 = arith.constant 0 : i32
    %c0_i32_1 = arith.constant 0 : i32
    return %c0_i32, %c0_i32_0 : i32, i32
  }
  func.func @transform_3(%arg0: i32) -> (i32, i32) {
    %c0_i32 = arith.constant 0 : i32
    %c0_i32_0 = arith.constant 0 : i32
    %c0_i32_1 = arith.constant 0 : i32
    return %c0_i32, %c0_i32_0 : i32, i32
  }
  func.func @transform_4(%arg0: i32) -> (i32, i32) {
    %c0_i32 = arith.constant 0 : i32
    %c0_i32_0 = arith.constant 0 : i32
    %c0_i32_1 = arith.constant 0 : i32
    return %c0_i32, %c0_i32_0 : i32, i32
  }
  func.func @transform_5(%arg0: i32) -> (i32, i32) {
    %c0_i32 = arith.constant 0 : i32
    %c0_i32_0 = arith.constant 0 : i32
    %c0_i32_1 = arith.constant 0 : i32
    return %c0_i32, %c0_i32_0 : i32, i32
  }
  func.func @transform_6(%arg0: i32) -> (i32, i32) {
    %c0_i32 = arith.constant 0 : i32
    %c0_i32_0 = arith.constant 0 : i32
    %c0_i32_1 = arith.constant 0 : i32
    return %c0_i32, %c0_i32_0 : i32, i32
  }
  func.func @transform_7(%arg0: i32) -> (i32, i32) {
    %c0_i32 = arith.constant 0 : i32
    %c0_i32_0 = arith.constant 0 : i32
    return %arg0, %c0_i32 : i32, i32
  }
}

</mosaic_0001>

<bundles_post_ra>
// kernel: actor_forward.1
= control target key start
LH: loop header
LB: loop body
LE: loop exit
PB: predicated region body
PF: predicated region fallthrough
CT: control target
= control target key end

     0   :  { %vm96_vm0 = vcmask 130048   ;;  %vm574_vm1 = vcmask 523264   ;;  %vm1517_vm2 = vcmask 31744   ;;  %s2918_s1 = inlined_call_operand.vmem [shape: f32[16,64], index: 1, kind: input, shape index: {}]   ;;  %s2919_s0 = inlined_call_operand.vmem [shape: f32[512,16], index: 0, kind: input, shape index: {}]   ;;  %s2920_s2 = inlined_call_operand.vmem [shape: f32[1,64], index: 2, kind: input, shape index: {}]   ;;  %s2921_s3 = inlined_call_operand.vmem [shape: f32[64,64], index: 3, kind: input, shape index: {}]   ;;  %s2922_s4 = inlined_call_operand.vmem [shape: f32[1,64], index: 4, kind: input, shape index: {}]   ;;  %s2923_s5 = inlined_call_operand.vmem [shape: f32[64,4], index: 5, kind: input, shape index: {}]   ;;  %s2924_s6 = inlined_call_operand.vmem [shape: f32[1,4], index: 6, kind: input, shape index: {}]   ;;  %s2925_s7 = inlined_call_operand.vmem [shape: f32[512,4], index: 7, kind: output, shape index: {}]  }
   0x1   :  { %v91_v0 = vld [vmem:[%s2918_s1 + $0x8] sm:$0xff]  ;;  %v90_v1 = vld [vmem:[%s2918_s1] sm:$0xff]  ;;  %v28_v4 = vld [vmem:[%s2919_s0 + $0x10] sm:$0xff] }
   0x2   :  { %303 = vmatpush.msra.mxu0 %v91_v0  ;;  %v26_v2 = vld [vmem:[%s2919_s0] sm:$0xff]  ;;  %1778 = vmatpush.msra.mxu3 %v91_v0  ;;  %v27_v3 = vld [vmem:[%s2919_s0 + $0x8] sm:$0xff]  ;;  %v29_v5 = vld [vmem:[%s2919_s0 + $0x18] sm:$0xff] }
   0x3   :  { %v30_v6 = vld [vmem:[%s2919_s0 + $0x20] sm:$0xff]  ;;  %v31_v7 = vld [vmem:[%s2919_s0 + $0x28] sm:$0xff]  ;;  %v32_v8 = vld [vmem:[%s2919_s0 + $0x30] sm:$0xff] }
   0x4   :  { %304 = vmatpush.msra.mxu0 %v90_v1  ;;  %1779 = vmatpush.msra.mxu3 %v90_v1  ;;  %v33_v9 = vld [vmem:[%s2919_s0 + $0x38] sm:$0xff]  ;;  %v34_v10 = vld [vmem:[%s2919_s0 + $0x40] sm:$0xff]  ;;  %v35_v11 = vld [vmem:[%s2919_s0 + $0x48] sm:$0xff] }
   0x5   :  { %1586 = vmatmul.msk.f32.vlgmr.msra.gmra.mxu0 %vm96_vm0, %v26_v2  ;;  %v36_v12 = vld [vmem:[%s2919_s0 + $0x50] sm:$0xff]  ;;  %v569_v13 = vld [vmem:[%s2921_s3 + $0x38] sm:$0xff]  ;;  %v567_v15 = vld [vmem:[%s2921_s3 + $0x28] sm:$0xff] }
   0x6   :  { %v568_v14 = vld [vmem:[%s2921_s3 + $0x30] sm:$0xff]  ;;  %775 = vmatpush.msra.mxu1 %v569_v13  ;;  %1780 = vmatpush.msrb.mxu3 %v569_v13  ;;  %v37_v16 = vld [vmem:[%s2919_s0 + $0x58] sm:$0xff]  ;;  %v566_v17 = vld [vmem:[%s2921_s3 + $0x20] sm:$0xff] }
   0x7   :  { %v565_v18 = vld [vmem:[%s2921_s3 + $0x18] sm:$0xff]  ;;  %v564_v19 = vld [vmem:[%s2921_s3 + $0x10] sm:$0xff]  ;;  %v38_v20 = vld [vmem:[%s2919_s0 + $0x60] sm:$0xff] }
   0x8   :  { %776 = vmatpush.msra.mxu1 %v568_v14  ;;  %1781 = vmatpush.msrb.mxu3 %v568_v14  ;;  %v563_v21 = vld [vmem:[%s2921_s3 + $0x8] sm:$0xff]  ;;  %v562_v22 = vld [vmem:[%s2921_s3] sm:$0xff]  ;;  %v40_v24 = vld [vmem:[%s2919_s0 + $0x70] sm:$0xff] }
   0x9   :  { %v39_v23 = vld [vmem:[%s2919_s0 + $0x68] sm:$0xff]  ;;  %v41_v25 = vld [vmem:[%s2919_s0 + $0x78] sm:$0xff]  ;;  %v2067_v26 = vld [vmem:[%s2920_s2] ss:$0 sm:$0xff] }
   0xa   :  { %777 = vmatpush.msra.mxu1 %v567_v15  ;;  %1782 = vmatpush.msrb.mxu3 %v567_v15  ;;  %v42_v28 = vld [vmem:[%s2919_s0 + $0x80] sm:$0xff]  ;;  %v43_v32 = vld [vmem:[%s2919_s0 + $0x88] sm:$0xff]  ;;  %v44_v36 = vld [vmem:[%s2919_s0 + $0x90] sm:$0xff] }
   0xb   :  { %v45_v40 = vld [vmem:[%s2919_s0 + $0x98] sm:$0xff]  ;;  %v46_v44 = vld [vmem:[%s2919_s0 + $0xa0] sm:$0xff]  ;;  %v47_v48 = vld [vmem:[%s2919_s0 + $0xa8] sm:$0xff] }
   0xc   :  { %778 = vmatpush.msra.mxu1 %v566_v17  ;;  %1783 = vmatpush.msrb.mxu3 %v566_v17  ;;  %v48_v52 = vld [vmem:[%s2919_s0 + $0xb0] sm:$0xff]  ;;  %v49_v56 = vld [vmem:[%s2919_s0 + $0xb8] sm:$0xff]  ;;  %v50_v60 = vld [vmem:[%s2919_s0 + $0xc0] sm:$0xff] }
   0xd   :  { %1587 = vmatmul.msk.f32.gmra.mxu0 %vm96_vm0, %v27_v3  ;;  %v51_v0 = vld [vmem:[%s2919_s0 + $0xc8] sm:$0xff]  ;;  %v2162_v14 = vld [vmem:[%s2923_s5 + $0x20] sm:$0xff]  ;;  %v2168_v15 = vld [vmem:[%s2923_s5 + $0x18] sm:$0xff] }
   0xe   :  { %779 = vmatpush.msra.mxu1 %v565_v18  ;;  %1784 = vmatpush.msrb.mxu3 %v565_v18  ;;  %v2155_v13 = vld [vmem:[%s2923_s5 + $0x28] sm:$0xff]  ;;  %v54_v17 = vld [vmem:[%s2919_s0 + $0xe0] sm:$0xff] }
  0x10   :  { %780 = vmatpush.msra.mxu1 %v564_v19  ;;  %1785 = vmatpush.msrb.mxu3 %v564_v19  ;;  %v2178_v19 = vld [vmem:[%s2923_s5 + $0x10] sm:$0xff] }
  0x12   :  { %781 = vmatpush.msra.mxu1 %v563_v21  ;;  %1786 = vmatpush.msrb.mxu3 %v563_v21  ;;  %v2185_v21 = vld [vmem:[%s2923_s5 + $0x8] sm:$0xff] }
  0x14   :  { %782 = vmatpush.msra.mxu1 %v562_v22  ;;  %1787 = vmatpush.msrb.mxu3 %v562_v22  ;;  %v2192_v22 = vld [vmem:[%s2923_s5] sm:$0xff] }
  0x15   :  { %1588 = vmatmul.msk.f32.gmra.mxu0 %vm96_vm0, %v28_v4  ;;  %v52_v4 = vld [vmem:[%s2919_s0 + $0xd0] sm:$0xff] }
  0x1d   :  { %1589 = vmatmul.msk.f32.gmra.mxu0 %vm96_vm0, %v29_v5 }
  0x25   :  { %1590 = vmatmul.msk.f32.gmra.mxu0 %vm96_vm0, %v30_v6 }
  0x2d   :  { %1591 = vmatmul.msk.f32.gmra.mxu0 %vm96_vm0, %v31_v7  ;;  %v2138_v7 = vld [vmem:[%s2923_s5 + $0x38] sm:$0xff] }
  0x2e   :  { %1252 = vmatpush.msra.mxu2 %v2138_v7 }
  0x35   :  { %1592 = vmatmul.msk.f32.gmra.mxu0 %vm96_vm0, %v32_v8 }
  0x3d   :  { %1593 = vmatmul.msk.f32.gmra.mxu0 %vm96_vm0, %v33_v9  ;;  %v53_v9 = vld [vmem:[%s2919_s0 + $0xd8] sm:$0xff] }
  0x45   :  { %1594 = vmatmul.msk.f32.gmra.mxu0 %vm96_vm0, %v34_v10 }
  0x4d   :  { %1595 = vmatmul.msk.f32.gmra.mxu0 %vm96_vm0, %v35_v11  ;;  %v2148_v11 = vld [vmem:[%s2923_s5 + $0x30] sm:$0xff] }
  0x4e   :  { %1253 = vmatpush.msra.mxu2 %v2148_v11 }
  0x50   :  { %1254 = vmatpush.msra.mxu2 %v2155_v13 }
  0x52   :  { %1255 = vmatpush.msra.mxu2 %v2162_v14 }
  0x54   :  { %1256 = vmatpush.msra.mxu2 %v2168_v15 }
  0x55   :  { %1596 = vmatmul.msk.f32.gmra.mxu0 %vm96_vm0, %v36_v12 }
  0x56   :  { %1257 = vmatpush.msra.mxu2 %v2178_v19 }
  0x58   :  { %1258 = vmatpush.msra.mxu2 %v2185_v21 }
  0x5a   :  { %1259 = vmatpush.msra.mxu2 %v2192_v22 }
  0x5d   :  { %1597 = vmatmul.msk.f32.gmra.mxu0 %vm96_vm0, %v37_v16 }
  0x65   :  { %1598 = vmatmul.msk.f32.gmra.mxu0 %vm96_vm0, %v38_v20 }
  0x6d   :  { %1599 = vmatmul.msk.f32.gmra.mxu0 %vm96_vm0, %v39_v23 }
  0x75   :  { %1600 = vmatmul.msk.f32.gmra.mxu0 %vm96_vm0, %v40_v24  ;;  %v55_v24 = vld [vmem:[%s2919_s0 + $0xe8] sm:$0xff] }
  0x7d   :  { %1601 = vmatmul.msk.f32.gmra.mxu0 %vm96_vm0, %v41_v25 }
  0x82   :  { %v306_v27 = vpop.f32.mrf.mxu0 }
  0x83   :  { %v307_v29 = vadd.f32 %v2067_v26, %v306_v27 }
  0x85   :  { %v498_v30 = vmax.f32 %v307_v29, 0.0  ;;  %1602 = vmatmul.msk.f32.gmra.mxu0 %vm96_vm0, %v42_v28  ;;  %v56_v29 = vld [vmem:[%s2919_s0 + $0xf0] sm:$0xff] }
  0x87   :  { %1650 = vmatmul.msk.f32.vlgmr.msra.gmra.mxu1 %vm574_vm1, %v498_v30 }
  0x8a   :  { %v309_v31 = vpop.f32.mrf.mxu0 }
  0x8b   :  { %v310_v33 = vadd.f32 %v2067_v26, %v309_v31 }
  0x8d   :  { %v499_v34 = vmax.f32 %v310_v33, 0.0  ;;  %1603 = vmatmul.msk.f32.gmra.mxu0 %vm96_vm0, %v43_v32  ;;  %v57_v33 = vld [vmem:[%s2919_s0 + $0xf8] sm:$0xff] }
  0x8f   :  { %1651 = vmatmul.msk.f32.gmra.mxu1 %vm574_vm1, %v499_v34 }
  0x92   :  { %v312_v35 = vpop.f32.mrf.mxu0 }
  0x93   :  { %v313_v37 = vadd.f32 %v2067_v26, %v312_v35 }
  0x95   :  { %v500_v38 = vmax.f32 %v313_v37, 0.0  ;;  %1604 = vmatmul.msk.f32.gmra.mxu0 %vm96_vm0, %v44_v36  ;;  %v2216_v36 = vld [vmem:[%s2922_s4] ss:$0 sm:$0xff] }
  0x97   :  { %1652 = vmatmul.msk.f32.gmra.mxu1 %vm574_vm1, %v500_v38  ;;  %v58_v38 = vld [vmem:[%s2919_s0 + $0x100] sm:$0xff] }
  0x9a   :  { %v315_v39 = vpop.f32.mrf.mxu0 }
  0x9b   :  { %v316_v41 = vadd.f32 %v2067_v26, %v315_v39 }
  0x9d   :  { %v501_v42 = vmax.f32 %v316_v41, 0.0  ;;  %1605 = vmatmul.msk.f32.gmra.mxu0 %vm96_vm0, %v45_v40 }
  0x9f   :  { %1653 = vmatmul.msk.f32.gmra.mxu1 %vm574_vm1, %v501_v42 }
  0xa2   :  { %v318_v43 = vpop.f32.mrf.mxu0 }
  0xa3   :  { %v319_v45 = vadd.f32 %v2067_v26, %v318_v43 }
  0xa5   :  { %v502_v46 = vmax.f32 %v319_v45, 0.0  ;;  %1606 = vmatmul.msk.f32.gmra.mxu0 %vm96_vm0, %v46_v44  ;;  %v59_v45 = vld [vmem:[%s2919_s0 + $0x108] sm:$0xff] }
  0xa7   :  { %1654 = vmatmul.msk.f32.gmra.mxu1 %vm574_vm1, %v502_v46 }
  0xaa   :  { %v321_v47 = vpop.f32.mrf.mxu0 }
  0xab   :  { %v322_v49 = vadd.f32 %v2067_v26, %v321_v47 }
  0xad   :  { %v503_v50 = vmax.f32 %v322_v49, 0.0  ;;  %1607 = vmatmul.msk.f32.gmra.mxu0 %vm96_vm0, %v47_v48 }
  0xaf   :  { %1655 = vmatmul.msk.f32.gmra.mxu1 %vm574_vm1, %v503_v50 }
  0xb2   :  { %v324_v51 = vpop.f32.mrf.mxu0 }
  0xb3   :  { %v325_v53 = vadd.f32 %v2067_v26, %v324_v51 }
  0xb5   :  { %v504_v54 = vmax.f32 %v325_v53, 0.0  ;;  %1608 = vmatmul.msk.f32.gmra.mxu0 %vm96_vm0, %v48_v52  ;;  %v60_v52 = vld [vmem:[%s2919_s0 + $0x110] sm:$0xff] }
  0xb7   :  { %1656 = vmatmul.msk.f32.gmra.mxu1 %vm574_vm1, %v504_v54 }
  0xba   :  { %v327_v55 = vpop.f32.mrf.mxu0 }
  0xbb   :  { %v328_v57 = vadd.f32 %v2067_v26, %v327_v55 }
  0xbd   :  { %v505_v58 = vmax.f32 %v328_v57, 0.0  ;;  %1609 = vmatmul.msk.f32.gmra.mxu0 %vm96_vm0, %v49_v56 }
  0xbf   :  { %1657 = vmatmul.msk.f32.gmra.mxu1 %vm574_vm1, %v505_v58 }
  0xc2   :  { %v330_v59 = vpop.f32.mrf.mxu0 }
  0xc3   :  { %v331_v61 = vadd.f32 %v2067_v26, %v330_v59  ;;  %v61_v59 = vld [vmem:[%s2919_s0 + $0x118] sm:$0xff] }
  0xc5   :  { %v506_v62 = vmax.f32 %v331_v61, 0.0  ;;  %1610 = vmatmul.msk.f32.gmra.mxu0 %vm96_vm0, %v50_v60 }
  0xc7   :  { %1658 = vmatmul.msk.f32.gmra.mxu1 %vm574_vm1, %v506_v62 }
  0xca   :  { %v333_v63 = vpop.f32.mrf.mxu0 }
  0xcb   :  { %v334_v1 = vadd.f32 %v2067_v26, %v333_v63 }
  0xcd   :  { %v507_v2 = vmax.f32 %v334_v1, 0.0  ;;  %1611 = vmatmul.msk.f32.gmra.mxu0 %vm96_vm0, %v51_v0 }
  0xcf   :  { %1659 = vmatmul.msk.f32.gmra.mxu1 %vm574_vm1, %v507_v2  ;;  %v62_v2 = vld [vmem:[%s2919_s0 + $0x120] sm:$0xff] }
  0xd2   :  { %v336_v3 = vpop.f32.mrf.mxu0 }
  0xd3   :  { %v337_v5 = vadd.f32 %v2067_v26, %v336_v3 }
  0xd5   :  { %v508_v6 = vmax.f32 %v337_v5, 0.0  ;;  %1612 = vmatmul.msk.f32.gmra.mxu0 %vm96_vm0, %v52_v4 }
  0xd7   :  { %1660 = vmatmul.msk.f32.gmra.mxu1 %vm574_vm1, %v508_v6 }
  0xda   :  { %v339_v8 = vpop.f32.mrf.mxu0 }
  0xdb   :  { %v340_v10 = vadd.f32 %v2067_v26, %v339_v8 }
  0xdd   :  { %v509_v12 = vmax.f32 %v340_v10, 0.0  ;;  %1613 = vmatmul.msk.f32.gmra.mxu0 %vm96_vm0, %v53_v9  ;;  %v63_v10 = vld [vmem:[%s2919_s0 + $0x128] sm:$0xff] }
  0xdf   :  { %1661 = vmatmul.msk.f32.gmra.mxu1 %vm574_vm1, %v509_v12 }
  0xe2   :  { %v342_v16 = vpop.f32.mrf.mxu0 }
  0xe3   :  { %v343_v18 = vadd.f32 %v2067_v26, %v342_v16 }
  0xe5   :  { %v510_v20 = vmax.f32 %v343_v18, 0.0  ;;  %1614 = vmatmul.msk.f32.gmra.mxu0 %vm96_vm0, %v54_v17 }
  0xe7   :  { %1662 = vmatmul.msk.f32.gmra.mxu1 %vm574_vm1, %v510_v20 }
  0xea   :  { %v345_v23 = vpop.f32.mrf.mxu0 }
  0xeb   :  { %v346_v25 = vadd.f32 %v2067_v26, %v345_v23 }
  0xed   :  { %v511_v27 = vmax.f32 %v346_v25, 0.0  ;;  %1615 = vmatmul.msk.f32.gmra.mxu0 %vm96_vm0, %v55_v24  ;;  %v64_v24 = vld [vmem:[%s2919_s0 + $0x130] sm:$0xff] }
  0xef   :  { %1663 = vmatmul.msk.f32.gmra.mxu1 %vm574_vm1, %v511_v27 }
  0xf2   :  { %v348_v28 = vpop.f32.mrf.mxu0 }
  0xf3   :  { %v349_v30 = vadd.f32 %v2067_v26, %v348_v28 }
  0xf5   :  { %v512_v31 = vmax.f32 %v349_v30, 0.0  ;;  %1616 = vmatmul.msk.f32.gmra.mxu0 %vm96_vm0, %v56_v29 }
  0xf7   :  { %1664 = vmatmul.msk.f32.gmra.mxu1 %vm574_vm1, %v512_v31 }
  0xfa   :  { %v351_v32 = vpop.f32.mrf.mxu0 }
  0xfb   :  { %v352_v34 = vadd.f32 %v2067_v26, %v351_v32  ;;  %v65_v32 = vld [vmem:[%s2919_s0 + $0x138] sm:$0xff] }
  0xfd   :  { %v513_v35 = vmax.f32 %v352_v34, 0.0  ;;  %1617 = vmatmul.msk.f32.gmra.mxu0 %vm96_vm0, %v57_v33 }
  0xff   :  { %1665 = vmatmul.msk.f32.gmra.mxu1 %vm574_vm1, %v513_v35 }
 0x102   :  { %v354_v37 = vpop.f32.mrf.mxu0 }
 0x103   :  { %v355_v39 = vadd.f32 %v2067_v26, %v354_v37 }
 0x104   :  { %v784_v40 = vpop.f32.mrf.mxu1 }
 0x105   :  { %v514_v41 = vmax.f32 %v355_v39, 0.0  ;;  %v785_v42 = vadd.f32 %v2216_v36, %v784_v40  ;;  %1618 = vmatmul.msk.f32.gmra.mxu0 %vm96_vm0, %v58_v38  ;;  %v66_v40 = vld [vmem:[%s2919_s0 + $0x140] sm:$0xff] }
 0x107   :  { %v976_v43 = vmax.f32 %v785_v42, 0.0  ;;  %1666 = vmatmul.msk.f32.gmra.mxu1 %vm574_vm1, %v514_v41 }
 0x109   :  { %1714 = vmatmul.msk.f32.vlgmr.msra.gmra.mxu2 %vm574_vm1, %v976_v43 }
 0x10a   :  { %v357_v44 = vpop.f32.mrf.mxu0 }
 0x10b   :  { %v358_v46 = vadd.f32 %v2067_v26, %v357_v44 }
 0x10c   :  { %v787_v47 = vpop.f32.mrf.mxu1 }
 0x10d   :  { %v515_v48 = vmax.f32 %v358_v46, 0.0  ;;  %v788_v49 = vadd.f32 %v2216_v36, %v787_v47  ;;  %1619 = vmatmul.msk.f32.gmra.mxu0 %vm96_vm0, %v59_v45  ;;  %v67_v47 = vld [vmem:[%s2919_s0 + $0x148] sm:$0xff] }
 0x10f   :  { %v977_v50 = vmax.f32 %v788_v49, 0.0  ;;  %1667 = vmatmul.msk.f32.gmra.mxu1 %vm574_vm1, %v515_v48 }
 0x111   :  { %1715 = vmatmul.msk.f32.gmra.mxu2 %vm574_vm1, %v977_v50 }
 0x112   :  { %v360_v51 = vpop.f32.mrf.mxu0 }
 0x113   :  { %v361_v53 = vadd.f32 %v2067_v26, %v360_v51 }
 0x114   :  { %v790_v54 = vpop.f32.mrf.mxu1 }
 0x115   :  { %v516_v55 = vmax.f32 %v361_v53, 0.0  ;;  %v791_v56 = vadd.f32 %v2216_v36, %v790_v54  ;;  %1620 = vmatmul.msk.f32.gmra.mxu0 %vm96_vm0, %v60_v52  ;;  %v68_v54 = vld [vmem:[%s2919_s0 + $0x150] sm:$0xff] }
 0x117   :  { %v978_v57 = vmax.f32 %v791_v56, 0.0  ;;  %1668 = vmatmul.msk.f32.gmra.mxu1 %vm574_vm1, %v516_v55 }
 0x119   :  { %1716 = vmatmul.msk.f32.gmra.mxu2 %vm574_vm1, %v978_v57 }
 0x11a   :  { %v363_v58 = vpop.f32.mrf.mxu0 }
 0x11b   :  { %v364_v60 = vadd.f32 %v2067_v26, %v363_v58 }
 0x11c   :  { %v793_v61 = vpop.f32.mrf.mxu1 }
 0x11d   :  { %v517_v62 = vmax.f32 %v364_v60, 0.0  ;;  %v794_v63 = vadd.f32 %v2216_v36, %v793_v61  ;;  %1621 = vmatmul.msk.f32.gmra.mxu0 %vm96_vm0, %v61_v59  ;;  %v69_v61 = vld [vmem:[%s2919_s0 + $0x158] sm:$0xff] }
 0x11f   :  { %v979_v0 = vmax.f32 %v794_v63, 0.0  ;;  %1669 = vmatmul.msk.f32.gmra.mxu1 %vm574_vm1, %v517_v62 }
 0x121   :  { %1717 = vmatmul.msk.f32.gmra.mxu2 %vm574_vm1, %v979_v0 }
 0x122   :  { %v366_v1 = vpop.f32.mrf.mxu0 }
 0x123   :  { %v367_v3 = vadd.f32 %v2067_v26, %v366_v1 }
 0x124   :  { %v796_v4 = vpop.f32.mrf.mxu1 }
 0x125   :  { %v518_v5 = vmax.f32 %v367_v3, 0.0  ;;  %v797_v6 = vadd.f32 %v2216_v36, %v796_v4  ;;  %1622 = vmatmul.msk.f32.gmra.mxu0 %vm96_vm0, %v62_v2  ;;  %v70_v4 = vld [vmem:[%s2919_s0 + $0x160] sm:$0xff] }
 0x127   :  { %v980_v8 = vmax.f32 %v797_v6, 0.0  ;;  %1670 = vmatmul.msk.f32.gmra.mxu1 %vm574_vm1, %v518_v5 }
 0x129   :  { %1718 = vmatmul.msk.f32.gmra.mxu2 %vm574_vm1, %v980_v8 }
 0x12a   :  { %v369_v9 = vpop.f32.mrf.mxu0 }
 0x12b   :  { %v370_v12 = vadd.f32 %v2067_v26, %v369_v9 }
 0x12c   :  { %v799_v16 = vpop.f32.mrf.mxu1 }
 0x12d   :  { %v519_v17 = vmax.f32 %v370_v12, 0.0  ;;  %v800_v18 = vadd.f32 %v2216_v36, %v799_v16  ;;  %1623 = vmatmul.msk.f32.gmra.mxu0 %vm96_vm0, %v63_v10  ;;  %v75_v10 = vld [vmem:[%s2919_s0 + $0x188] sm:$0xff] }
 0x12e   :  { %1635 = vmatmul.msk.f32.vlgmr.msra.gmra.mxu3 %vm96_vm0, %v75_v10  ;;  %v82_v10 = vld [vmem:[%s2919_s0 + $0x1c0] sm:$0xff] }
 0x12f   :  { %v981_v20 = vmax.f32 %v800_v18, 0.0  ;;  %1671 = vmatmul.msk.f32.gmra.mxu1 %vm574_vm1, %v519_v17  ;;  %1788 = vmatpush.msra.mxu3 %v2138_v7  ;;  %v71_v17 = vld [vmem:[%s2919_s0 + $0x168] sm:$0xff]  ;;  %v76_v7 = vld [vmem:[%s2919_s0 + $0x190] sm:$0xff] }
 0x131   :  { %1719 = vmatmul.msk.f32.gmra.mxu2 %vm574_vm1, %v981_v20  ;;  %1789 = vmatpush.msra.mxu3 %v2148_v11 }
 0x132   :  { %v372_v23 = vpop.f32.mrf.mxu0 }
 0x133   :  { %v373_v25 = vadd.f32 %v2067_v26, %v372_v23  ;;  %1790 = vmatpush.msra.mxu3 %v2155_v13  ;;  %v72_v13 = vld [vmem:[%s2919_s0 + $0x170] sm:$0xff] }
 0x134   :  { %v802_v27 = vpop.f32.mrf.mxu1 }
 0x135   :  { %v520_v28 = vmax.f32 %v373_v25, 0.0  ;;  %v803_v29 = vadd.f32 %v2216_v36, %v802_v27  ;;  %1624 = vmatmul.msk.f32.gmra.mxu0 %vm96_vm0, %v64_v24  ;;  %1791 = vmatpush.msra.mxu3 %v2162_v14 }
 0x136   :  { %1636 = vmatmul.msk.f32.gmra.mxu3 %vm96_vm0, %v76_v7 }
 0x137   :  { %v982_v30 = vmax.f32 %v803_v29, 0.0  ;;  %1672 = vmatmul.msk.f32.gmra.mxu1 %vm574_vm1, %v520_v28  ;;  %1792 = vmatpush.msra.mxu3 %v2168_v15  ;;  %v77_v15 = vld [vmem:[%s2919_s0 + $0x198] sm:$0xff] }
 0x139   :  { %1720 = vmatmul.msk.f32.gmra.mxu2 %vm574_vm1, %v982_v30  ;;  %1793 = vmatpush.msra.mxu3 %v2178_v19 }
 0x13a   :  { %v375_v31 = vpop.f32.mrf.mxu0 }
 0x13b   :  { %v376_v33 = vadd.f32 %v2067_v26, %v375_v31  ;;  %1794 = vmatpush.msra.mxu3 %v2185_v21  ;;  %v73_v21 = vld [vmem:[%s2919_s0 + $0x178] sm:$0xff] }
 0x13c   :  { %v805_v34 = vpop.f32.mrf.mxu1 }
 0x13d   :  { %v521_v35 = vmax.f32 %v376_v33, 0.0  ;;  %v806_v37 = vadd.f32 %v2216_v36, %v805_v34  ;;  %1625 = vmatmul.msk.f32.gmra.mxu0 %vm96_vm0, %v65_v32  ;;  %1795 = vmatpush.msra.mxu3 %v2192_v22  ;;  %v78_v22 = vld [vmem:[%s2919_s0 + $0x1a0] sm:$0xff] }
 0x13e   :  { %1637 = vmatmul.msk.f32.gmra.mxu3 %vm96_vm0, %v77_v15 }
 0x13f   :  { %v983_v38 = vmax.f32 %v806_v37, 0.0  ;;  %1673 = vmatmul.msk.f32.gmra.mxu1 %vm574_vm1, %v521_v35 }
 0x141   :  { %1721 = vmatmul.msk.f32.gmra.mxu2 %vm574_vm1, %v983_v38  ;;  %v74_v38 = vld [vmem:[%s2919_s0 + $0x180] sm:$0xff] }
 0x142   :  { %v378_v39 = vpop.f32.mrf.mxu0 }
 0x143   :  { %v379_v41 = vadd.f32 %v2067_v26, %v378_v39 }
 0x144   :  { %v808_v42 = vpop.f32.mrf.mxu1 }
 0x145   :  { %v522_v43 = vmax.f32 %v379_v41, 0.0  ;;  %v809_v44 = vadd.f32 %v2216_v36, %v808_v42  ;;  %1626 = vmatmul.msk.f32.gmra.mxu0 %vm96_vm0, %v66_v40 }
 0x146   :  { %1638 = vmatmul.msk.f32.gmra.mxu3 %vm96_vm0, %v78_v22 }
 0x147   :  { %v984_v45 = vmax.f32 %v809_v44, 0.0  ;;  %1674 = vmatmul.msk.f32.gmra.mxu1 %vm574_vm1, %v522_v43  ;;  %v79_v43 = vld [vmem:[%s2919_s0 + $0x1a8] sm:$0xff] }
 0x149   :  { %1722 = vmatmul.msk.f32.gmra.mxu2 %vm574_vm1, %v984_v45  ;;  %v2385_v45 = vld [vmem:[%s2924_s6] ss:$0 sm:$0xff] }
 0x14a   :  { %v381_v46 = vpop.f32.mrf.mxu0 }
 0x14b   :  { %v382_v48 = vadd.f32 %v2067_v26, %v381_v46 }
 0x14c   :  { %v811_v49 = vpop.f32.mrf.mxu1 }
 0x14d   :  { %v523_v50 = vmax.f32 %v382_v48, 0.0  ;;  %v812_v51 = vadd.f32 %v2216_v36, %v811_v49  ;;  %1627 = vmatmul.msk.f32.gmra.mxu0 %vm96_vm0, %v67_v47 }
 0x14e   :  { %1639 = vmatmul.msk.f32.gmra.mxu3 %vm96_vm0, %v79_v43 }
 0x14f   :  { %v985_v52 = vmax.f32 %v812_v51, 0.0  ;;  %1675 = vmatmul.msk.f32.gmra.mxu1 %vm574_vm1, %v523_v50 }
 0x151   :  { %1723 = vmatmul.msk.f32.gmra.mxu2 %vm574_vm1, %v985_v52 }
 0x152   :  { %v384_v53 = vpop.f32.mrf.mxu0 }
 0x153   :  { %v385_v55 = vadd.f32 %v2067_v26, %v384_v53  ;;  %v80_v53 = vld [vmem:[%s2919_s0 + $0x1b0] sm:$0xff] }
 0x154   :  { %v814_v56 = vpop.f32.mrf.mxu1 }
 0x155   :  { %v524_v57 = vmax.f32 %v385_v55, 0.0  ;;  %v815_v58 = vadd.f32 %v2216_v36, %v814_v56  ;;  %1628 = vmatmul.msk.f32.gmra.mxu0 %vm96_vm0, %v68_v54 }
 0x156   :  { %1640 = vmatmul.msk.f32.gmra.mxu3 %vm96_vm0, %v80_v53 }
 0x157   :  { %v986_v59 = vmax.f32 %v815_v58, 0.0  ;;  %1676 = vmatmul.msk.f32.gmra.mxu1 %vm574_vm1, %v524_v57 }
 0x159   :  { %1724 = vmatmul.msk.f32.gmra.mxu2 %vm574_vm1, %v986_v59 }
 0x15a   :  { %v387_v60 = vpop.f32.mrf.mxu0 }
 0x15b   :  { %v388_v62 = vadd.f32 %v2067_v26, %v387_v60 }
 0x15c   :  { %v817_v63 = vpop.f32.mrf.mxu1 }
 0x15d   :  { %v525_v0 = vmax.f32 %v388_v62, 0.0  ;;  %v818_v1 = vadd.f32 %v2216_v36, %v817_v63  ;;  %1629 = vmatmul.msk.f32.gmra.mxu0 %vm96_vm0, %v69_v61  ;;  %v81_v63 = vld [vmem:[%s2919_s0 + $0x1b8] sm:$0xff] }
 0x15e   :  { %1641 = vmatmul.msk.f32.gmra.mxu3 %vm96_vm0, %v81_v63 }
 0x15f   :  { %v987_v2 = vmax.f32 %v818_v1, 0.0  ;;  %1677 = vmatmul.msk.f32.gmra.mxu1 %vm574_vm1, %v525_v0 }
 0x161   :  { %1725 = vmatmul.msk.f32.gmra.mxu2 %vm574_vm1, %v987_v2 }
 0x162   :  { %v390_v3 = vpop.f32.mrf.mxu0 }
 0x163   :  { %v391_v5 = vadd.f32 %v2067_v26, %v390_v3 }
 0x164   :  { %v820_v6 = vpop.f32.mrf.mxu1 }
 0x165   :  { %v526_v8 = vmax.f32 %v391_v5, 0.0  ;;  %v821_v9 = vadd.f32 %v2216_v36, %v820_v6  ;;  %1630 = vmatmul.msk.f32.gmra.mxu0 %vm96_vm0, %v70_v4 }
 0x166   :  { %1642 = vmatmul.msk.f32.gmra.mxu3 %vm96_vm0, %v82_v10 }
 0x167   :  { %v988_v12 = vmax.f32 %v821_v9, 0.0  ;;  %1678 = vmatmul.msk.f32.gmra.mxu1 %vm574_vm1, %v526_v8 }
 0x169   :  { %1726 = vmatmul.msk.f32.gmra.mxu2 %vm574_vm1, %v988_v12 }
 0x16a   :  { %v393_v16 = vpop.f32.mrf.mxu0 }
 0x16b   :  { %v394_v18 = vadd.f32 %v2067_v26, %v393_v16 }
 0x16c   :  { %v823_v20 = vpop.f32.mrf.mxu1 }
 0x16d   :  { %v527_v23 = vmax.f32 %v394_v18, 0.0  ;;  %v824_v24 = vadd.f32 %v2216_v36, %v823_v20  ;;  %1631 = vmatmul.msk.f32.gmra.mxu0 %vm96_vm0, %v71_v17 }
 0x16f   :  { %v989_v25 = vmax.f32 %v824_v24, 0.0  ;;  %1679 = vmatmul.msk.f32.gmra.mxu1 %vm574_vm1, %v527_v23 }
 0x171   :  { %1727 = vmatmul.msk.f32.gmra.mxu2 %vm574_vm1, %v989_v25 }
 0x172   :  { %v396_v11 = vpop.f32.mrf.mxu0 }
 0x173   :  { %v397_v27 = vadd.f32 %v2067_v26, %v396_v11  ;;  %v83_v11 = vld [vmem:[%s2919_s0 + $0x1c8] sm:$0xff] }
 0x174   :  { %v826_v28 = vpop.f32.mrf.mxu1  ;;  %1643 = vmatmul.msk.f32.gmra.mxu3 %vm96_vm0, %v83_v11 }
 0x175   :  { %v528_v14 = vmax.f32 %v397_v27, 0.0  ;;  %v827_v29 = vadd.f32 %v2216_v36, %v826_v28  ;;  %1632 = vmatmul.msk.f32.gmra.mxu0 %vm96_vm0, %v72_v13 }
 0x177   :  { %v990_v30 = vmax.f32 %v827_v29, 0.0  ;;  %1680 = vmatmul.msk.f32.gmra.mxu1 %vm574_vm1, %v528_v14 }
 0x179   :  { %1728 = vmatmul.msk.f32.gmra.mxu2 %vm574_vm1, %v990_v30 }
 0x17a   :  { %v399_v19 = vpop.f32.mrf.mxu0 }
 0x17b   :  { %v400_v31 = vadd.f32 %v2067_v26, %v399_v19 }
 0x17c   :  { %v829_v32 = vpop.f32.mrf.mxu1 }
 0x17d   :  { %v529_v33 = vmax.f32 %v400_v31, 0.0  ;;  %v830_v34 = vadd.f32 %v2216_v36, %v829_v32  ;;  %1633 = vmatmul.msk.f32.gmra.mxu0 %vm96_vm0, %v73_v21  ;;  %v84_v31 = vld [vmem:[%s2919_s0 + $0x1d0] sm:$0xff] }
 0x17e   :  { %1644 = vmatmul.msk.f32.gmra.mxu3 %vm96_vm0, %v84_v31 }
 0x17f   :  { %v991_v35 = vmax.f32 %v830_v34, 0.0  ;;  %1681 = vmatmul.msk.f32.gmra.mxu1 %vm574_vm1, %v529_v33 }
 0x181   :  { %1729 = vmatmul.msk.f32.gmra.mxu2 %vm574_vm1, %v991_v35 }
 0x182   :  { %v402_v37 = vpop.f32.mrf.mxu0 }
 0x183   :  { %v403_v39 = vadd.f32 %v2067_v26, %v402_v37 }
 0x184   :  { %v832_v40 = vpop.f32.mrf.mxu1 }
 0x185   :  { %v530_v41 = vmax.f32 %v403_v39, 0.0  ;;  %v833_v42 = vadd.f32 %v2216_v36, %v832_v40  ;;  %1634 = vmatmul.msk.f32.gmra.mxu0 %vm96_vm0, %v74_v38 }
 0x187   :  { %v992_v44 = vmax.f32 %v833_v42, 0.0  ;;  %1682 = vmatmul.msk.f32.gmra.mxu1 %vm574_vm1, %v530_v41  ;;  %v85_v41 = vld [vmem:[%s2919_s0 + $0x1d8] sm:$0xff] }
 0x188   :  { %1645 = vmatmul.msk.f32.gmra.mxu3 %vm96_vm0, %v85_v41 }
 0x189   :  { %1730 = vmatmul.msk.f32.gmra.mxu2 %vm574_vm1, %v992_v44 }
 0x18a   :  { %v405_v46 = vpop.f32.mrf.mxu0 }
 0x18b   :  { %v406_v47 = vadd.f32 %v2067_v26, %v405_v46 }
 0x18c   :  { %v835_v48 = vpop.f32.mrf.mxu1  ;;  %v1261_v49 = vpop.f32.mrf.mxu2 }
 0x18d   :  { %v531_v50 = vmax.f32 %v406_v47, 0.0  ;;  %v836_v51 = vadd.f32 %v2216_v36, %v835_v48  ;;  %v1262_v52 = vadd.f32 %v2385_v45, %v1261_v49 }
 0x18f   :  { %v993_v54 = vmax.f32 %v836_v51, 0.0  ;;  %1799 = vtanh.f32 %v1262_v52  ;;  %1683 = vmatmul.msk.f32.gmra.mxu1 %vm574_vm1, %v531_v50  ;;  %v86_v52 = vld [vmem:[%s2919_s0 + $0x1e0] sm:$0xff] }
 0x190   :  { %1646 = vmatmul.msk.f32.gmra.mxu3 %vm96_vm0, %v86_v52 }
 0x191   :  { %1731 = vmatmul.msk.f32.gmra.mxu2 %vm574_vm1, %v993_v54 }
 0x192   :  { %v408_v55 = vpop.f32.mrf.mxu0 }
 0x193   :  { %v409_v56 = vadd.f32 %v2067_v26, %v408_v55 }
 0x194   :  { %v838_v57 = vpop.f32.mrf.mxu1  ;;  %v1264_v58 = vpop.f32.mrf.mxu2 }
 0x195   :  { %v1800_v59 = vpop.eup %1799  ;;  %v532_v60 = vmax.f32 %v409_v56, 0.0  ;;  %v839_v61 = vadd.f32 %v2216_v36, %v838_v57  ;;  %v1265_v62 = vadd.f32 %v2385_v45, %v1264_v58 }
 0x196   :  { %1518 = vst.msk [vmem:[%s2925_s7] sm:$0xff] %vm1517_vm2, %v1800_v59 }
 0x197   :  { %v994_v0 = vmax.f32 %v839_v61, 0.0  ;;  %1801 = vtanh.f32 %v1265_v62  ;;  %1684 = vmatmul.msk.f32.gmra.mxu1 %vm574_vm1, %v532_v60  ;;  %v87_v62 = vld [vmem:[%s2919_s0 + $0x1e8] sm:$0xff] }
 0x198   :  { %1647 = vmatmul.msk.f32.gmra.mxu3 %vm96_vm0, %v87_v62 }
 0x199   :  { %1732 = vmatmul.msk.f32.gmra.mxu2 %vm574_vm1, %v994_v0 }
 0x19a   :  { %v411_v1 = vpop.f32.mrf.mxu0 }
 0x19b   :  { %v412_v2 = vadd.f32 %v2067_v26, %v411_v1 }
 0x19c   :  { %v841_v3 = vpop.f32.mrf.mxu1  ;;  %v1267_v4 = vpop.f32.mrf.mxu2 }
 0x19d   :  { %v1802_v5 = vpop.eup %1801  ;;  %v533_v6 = vmax.f32 %v412_v2, 0.0  ;;  %v842_v8 = vadd.f32 %v2216_v36, %v841_v3  ;;  %v1268_v9 = vadd.f32 %v2385_v45, %v1267_v4 }
 0x19e   :  { %1519 = vst.msk [vmem:[%s2925_s7 + $0x8] sm:$0xff] %vm1517_vm2, %v1802_v5 }
 0x19f   :  { %v995_v12 = vmax.f32 %v842_v8, 0.0  ;;  %1803 = vtanh.f32 %v1268_v9  ;;  %1685 = vmatmul.msk.f32.gmra.mxu1 %vm574_vm1, %v533_v6  ;;  %v88_v9 = vld [vmem:[%s2919_s0 + $0x1f0] sm:$0xff] }
 0x1a0   :  { %1648 = vmatmul.msk.f32.gmra.mxu3 %vm96_vm0, %v88_v9 }
 0x1a1   :  { %1733 = vmatmul.msk.f32.gmra.mxu2 %vm574_vm1, %v995_v12 }
 0x1a2   :  { %v414_v16 = vpop.f32.mrf.mxu0 }
 0x1a3   :  { %v415_v17 = vadd.f32 %v2067_v26, %v414_v16 }
 0x1a4   :  { %v844_v18 = vpop.f32.mrf.mxu1  ;;  %v1270_v20 = vpop.f32.mrf.mxu2 }
 0x1a5   :  { %v1804_v23 = vpop.eup %1803  ;;  %v534_v24 = vmax.f32 %v415_v17, 0.0  ;;  %v845_v7 = vadd.f32 %v2216_v36, %v844_v18  ;;  %v1271_v25 = vadd.f32 %v2385_v45, %v1270_v20 }
 0x1a6   :  { %1520 = vst.msk [vmem:[%s2925_s7 + $0x10] sm:$0xff] %vm1517_vm2, %v1804_v23 }
 0x1a7   :  { %v996_v13 = vmax.f32 %v845_v7, 0.0  ;;  %1805 = vtanh.f32 %v1271_v25  ;;  %1686 = vmatmul.msk.f32.gmra.mxu1 %vm574_vm1, %v534_v24  ;;  %v89_v25 = vld [vmem:[%s2919_s0 + $0x1f8] sm:$0xff] }
 0x1a8   :  { %1649 = vmatmul.msk.f32.gmra.mxu3 %vm96_vm0, %v89_v25 }
 0x1a9   :  { %1734 = vmatmul.msk.f32.gmra.mxu2 %vm574_vm1, %v996_v13 }
 0x1aa   :  { %v417_v27 = vpop.f32.mrf.mxu0 }
 0x1ab   :  { %v418_v28 = vadd.f32 %v2067_v26, %v417_v27 }
 0x1ac   :  { %v847_v14 = vpop.f32.mrf.mxu1  ;;  %v1273_v29 = vpop.f32.mrf.mxu2 }
 0x1ad   :  { %v1806_v15 = vpop.eup %1805  ;;  %v535_v30 = vmax.f32 %v418_v28, 0.0  ;;  %v848_v19 = vadd.f32 %v2216_v36, %v847_v14  ;;  %v1274_v21 = vadd.f32 %v2385_v45, %v1273_v29 }
 0x1ae   :  { %1521 = vst.msk [vmem:[%s2925_s7 + $0x18] sm:$0xff] %vm1517_vm2, %v1806_v15 }
 0x1af   :  { %v997_v32 = vmax.f32 %v848_v19, 0.0  ;;  %1807 = vtanh.f32 %v1274_v21  ;;  %1687 = vmatmul.msk.f32.gmra.mxu1 %vm574_vm1, %v535_v30 }
 0x1b1   :  { %1735 = vmatmul.msk.f32.gmra.mxu2 %vm574_vm1, %v997_v32  ;;  %v453_v41 = vpop.f32.mrf.mxu3 }
 0x1b2   :  { %v420_v33 = vpop.f32.mrf.mxu0 }
 0x1b3   :  { %v421_v34 = vadd.f32 %v2067_v26, %v420_v33 }
 0x1b4   :  { %v850_v22 = vpop.f32.mrf.mxu1  ;;  %v1276_v35 = vpop.f32.mrf.mxu2 }
 0x1b5   :  { %v1808_v37 = vpop.eup %1807  ;;  %v536_v38 = vmax.f32 %v421_v34, 0.0  ;;  %v851_v39 = vadd.f32 %v2216_v36, %v850_v22  ;;  %v1277_v40 = vadd.f32 %v2385_v45, %v1276_v35 }
 0x1b6   :  { %1522 = vst.msk [vmem:[%s2925_s7 + $0x20] sm:$0xff] %vm1517_vm2, %v1808_v37 }
 0x1b7   :  { %v998_v42 = vmax.f32 %v851_v39, 0.0  ;;  %1809 = vtanh.f32 %v1277_v40  ;;  %1688 = vmatmul.msk.f32.gmra.mxu1 %vm574_vm1, %v536_v38 }
 0x1b9   :  { %1736 = vmatmul.msk.f32.gmra.mxu2 %vm574_vm1, %v998_v42  ;;  %v456_v52 = vpop.f32.mrf.mxu3 }
 0x1ba   :  { %v423_v43 = vpop.f32.mrf.mxu0 }
 0x1bb   :  { %v424_v44 = vadd.f32 %v2067_v26, %v423_v43 }
 0x1bc   :  { %v853_v46 = vpop.f32.mrf.mxu1  ;;  %v1279_v47 = vpop.f32.mrf.mxu2 }
 0x1bd   :  { %v1810_v48 = vpop.eup %1809  ;;  %v537_v49 = vmax.f32 %v424_v44, 0.0  ;;  %v854_v50 = vadd.f32 %v2216_v36, %v853_v46  ;;  %v1280_v51 = vadd.f32 %v2385_v45, %v1279_v47 }
 0x1be   :  { %1523 = vst.msk [vmem:[%s2925_s7 + $0x28] sm:$0xff] %vm1517_vm2, %v1810_v48 }
 0x1bf   :  { %v999_v53 = vmax.f32 %v854_v50, 0.0  ;;  %1811 = vtanh.f32 %v1280_v51  ;;  %1689 = vmatmul.msk.f32.gmra.mxu1 %vm574_vm1, %v537_v49 }
 0x1c1   :  { %1737 = vmatmul.msk.f32.gmra.mxu2 %vm574_vm1, %v999_v53 }
 0x1c2   :  { %v426_v54 = vpop.f32.mrf.mxu0 }
 0x1c3   :  { %v427_v55 = vadd.f32 %v2067_v26, %v426_v54 }
 0x1c4   :  { %v856_v56 = vpop.f32.mrf.mxu1  ;;  %v1282_v57 = vpop.f32.mrf.mxu2 }
 0x1c5   :  { %v1812_v58 = vpop.eup %1811  ;;  %v538_v59 = vmax.f32 %v427_v55, 0.0  ;;  %v857_v60 = vadd.f32 %v2216_v36, %v856_v56  ;;  %v1283_v61 = vadd.f32 %v2385_v45, %v1282_v57 }
 0x1c6   :  { %1524 = vst.msk [vmem:[%s2925_s7 + $0x30] sm:$0xff] %vm1517_vm2, %v1812_v58 }
 0x1c7   :  { %v1000_v63 = vmax.f32 %v857_v60, 0.0  ;;  %1813 = vtanh.f32 %v1283_v61  ;;  %1690 = vmatmul.msk.f32.gmra.mxu1 %vm574_vm1, %v538_v59  ;;  %v2552_v61 = vld [vmem:[%s2920_s2] ss:$0 sm:$0xff] }
 0x1c9   :  { %1738 = vmatmul.msk.f32.gmra.mxu2 %vm574_vm1, %v1000_v63  ;;  %v459_v63 = vpop.f32.mrf.mxu3 }
 0x1ca   :  { %v429_v0 = vpop.f32.mrf.mxu0 }
 0x1cb   :  { %v430_v1 = vadd.f32 %v2067_v26, %v429_v0 }
 0x1cc   :  { %v859_v2 = vpop.f32.mrf.mxu1  ;;  %v1285_v3 = vpop.f32.mrf.mxu2 }
 0x1cd   :  { %v1814_v4 = vpop.eup %1813  ;;  %v539_v5 = vmax.f32 %v430_v1, 0.0  ;;  %v860_v6 = vadd.f32 %v2216_v36, %v859_v2  ;;  %v1286_v8 = vadd.f32 %v2385_v45, %v1285_v3 }
 0x1ce   :  { %1525 = vst.msk [vmem:[%s2925_s7 + $0x38] sm:$0xff] %vm1517_vm2, %v1814_v4 }
 0x1cf   :  { %v1001_v10 = vmax.f32 %v860_v6, 0.0  ;;  %1815 = vtanh.f32 %v1286_v8  ;;  %1691 = vmatmul.msk.f32.gmra.mxu1 %vm574_vm1, %v539_v5 }
 0x1d1   :  { %1739 = vmatmul.msk.f32.gmra.mxu2 %vm574_vm1, %v1001_v10 }
 0x1d2   :  { %v432_v12 = vpop.f32.mrf.mxu0 }
 0x1d3   :  { %v433_v16 = vadd.f32 %v2067_v26, %v432_v12 }
 0x1d4   :  { %v862_v17 = vpop.f32.mrf.mxu1  ;;  %v1288_v18 = vpop.f32.mrf.mxu2 }
 0x1d5   :  { %v1816_v20 = vpop.eup %1815  ;;  %v540_v23 = vmax.f32 %v433_v16, 0.0  ;;  %v863_v24 = vadd.f32 %v2216_v36, %v862_v17  ;;  %v1289_v7 = vadd.f32 %v2385_v45, %v1288_v18 }
 0x1d6   :  { %1526 = vst.msk [vmem:[%s2925_s7 + $0x40] sm:$0xff] %vm1517_vm2, %v1816_v20 }
 0x1d7   :  { %v1002_v11 = vmax.f32 %v863_v24, 0.0  ;;  %1817 = vtanh.f32 %v1289_v7  ;;  %1692 = vmatmul.msk.f32.gmra.mxu1 %vm574_vm1, %v540_v23  ;;  %v462_v23 = vpop.f32.mrf.mxu3  ;;  %v454_v7 = vadd.f32 %v2552_v61, %v453_v41 }
 0x1d9   :  { %1740 = vmatmul.msk.f32.gmra.mxu2 %vm574_vm1, %v1002_v11  ;;  %v547_v25 = vmax.f32 %v454_v7, 0.0 }
 0x1da   :  { %v435_v13 = vpop.f32.mrf.mxu0 }
 0x1db   :  { %v436_v27 = vadd.f32 %v2067_v26, %v435_v13 }
 0x1dc   :  { %v865_v28 = vpop.f32.mrf.mxu1  ;;  %v1291_v14 = vpop.f32.mrf.mxu2 }
 0x1dd   :  { %v1818_v29 = vpop.eup %1817  ;;  %v541_v15 = vmax.f32 %v436_v27, 0.0  ;;  %v866_v30 = vadd.f32 %v2216_v36, %v865_v28  ;;  %v1292_v19 = vadd.f32 %v2385_v45, %v1291_v14 }
 0x1de   :  { %1527 = vst.msk [vmem:[%s2925_s7 + $0x48] sm:$0xff] %vm1517_vm2, %v1818_v29 }
 0x1df   :  { %v1003_v21 = vmax.f32 %v866_v30, 0.0  ;;  %1819 = vtanh.f32 %v1292_v19  ;;  %1693 = vmatmul.msk.f32.gmra.mxu1 %vm574_vm1, %v541_v15  ;;  %v457_v15 = vadd.f32 %v2552_v61, %v456_v52  ;;  %v465_v30 = vpop.f32.mrf.mxu3 }
 0x1e1   :  { %1741 = vmatmul.msk.f32.gmra.mxu2 %vm574_vm1, %v1003_v21  ;;  %v548_v19 = vmax.f32 %v457_v15, 0.0 }
 0x1e2   :  { %v438_v31 = vpop.f32.mrf.mxu0 }
 0x1e3   :  { %v439_v32 = vadd.f32 %v2067_v26, %v438_v31 }
 0x1e4   :  { %v868_v33 = vpop.f32.mrf.mxu1  ;;  %v1294_v34 = vpop.f32.mrf.mxu2 }
 0x1e5   :  { %v1820_v22 = vpop.eup %1819  ;;  %v542_v35 = vmax.f32 %v439_v32, 0.0  ;;  %v869_v37 = vadd.f32 %v2216_v36, %v868_v33  ;;  %v1295_v38 = vadd.f32 %v2385_v45, %v1294_v34 }
 0x1e6   :  { %1528 = vst.msk [vmem:[%s2925_s7 + $0x50] sm:$0xff] %vm1517_vm2, %v1820_v22 }
 0x1e7   :  { %v1004_v39 = vmax.f32 %v869_v37, 0.0  ;;  %1821 = vtanh.f32 %v1295_v38  ;;  %1694 = vmatmul.msk.f32.gmra.mxu1 %vm574_vm1, %v542_v35  ;;  %v460_v35 = vadd.f32 %v2552_v61, %v459_v63  ;;  %v468_v37 = vpop.f32.mrf.mxu3 }
 0x1e9   :  { %1742 = vmatmul.msk.f32.gmra.mxu2 %vm574_vm1, %v1004_v39  ;;  %v549_v38 = vmax.f32 %v460_v35, 0.0 }
 0x1ea   :  { %v441_v40 = vpop.f32.mrf.mxu0 }
 0x1eb   :  { %v442_v42 = vadd.f32 %v2067_v26, %v441_v40 }
 0x1ec   :  { %v871_v43 = vpop.f32.mrf.mxu1  ;;  %v1297_v44 = vpop.f32.mrf.mxu2 }
 0x1ed   :  { %v1822_v46 = vpop.eup %1821  ;;  %v543_v47 = vmax.f32 %v442_v42, 0.0  ;;  %v872_v48 = vadd.f32 %v2216_v36, %v871_v43  ;;  %v1298_v49 = vadd.f32 %v2385_v45, %v1297_v44 }
 0x1ee   :  { %1529 = vst.msk [vmem:[%s2925_s7 + $0x58] sm:$0xff] %vm1517_vm2, %v1822_v46  ;;  %v463_v46 = vadd.f32 %v2552_v61, %v462_v23 }
 0x1ef   :  { %v1005_v50 = vmax.f32 %v872_v48, 0.0  ;;  %1823 = vtanh.f32 %v1298_v49  ;;  %1695 = vmatmul.msk.f32.gmra.mxu1 %vm574_vm1, %v543_v47  ;;  %v471_v48 = vpop.f32.mrf.mxu3 }
 0x1f0   :  { %v550_v47 = vmax.f32 %v463_v46, 0.0 }
 0x1f1   :  { %1743 = vmatmul.msk.f32.gmra.mxu2 %vm574_vm1, %v1005_v50 }
 0x1f2   :  { %v444_v51 = vpop.f32.mrf.mxu0 }
 0x1f3   :  { %v445_v53 = vadd.f32 %v2067_v26, %v444_v51 }
 0x1f4   :  { %v874_v54 = vpop.f32.mrf.mxu1  ;;  %v1300_v55 = vpop.f32.mrf.mxu2 }
 0x1f5   :  { %v1824_v56 = vpop.eup %1823  ;;  %v544_v57 = vmax.f32 %v445_v53, 0.0  ;;  %v875_v58 = vadd.f32 %v2216_v36, %v874_v54  ;;  %v1301_v59 = vadd.f32 %v2385_v45, %v1300_v55  ;;  %v466_v55 = vadd.f32 %v2552_v61, %v465_v30 }
 0x1f6   :  { %1530 = vst.msk [vmem:[%s2925_s7 + $0x60] sm:$0xff] %vm1517_vm2, %v1824_v56 }
 0x1f7   :  { %v1006_v60 = vmax.f32 %v875_v58, 0.0  ;;  %1825 = vtanh.f32 %v1301_v59  ;;  %1696 = vmatmul.msk.f32.gmra.mxu1 %vm574_vm1, %v544_v57  ;;  %v551_v56 = vmax.f32 %v466_v55, 0.0 }
 0x1f9   :  { %1744 = vmatmul.msk.f32.gmra.mxu2 %vm574_vm1, %v1006_v60 }
 0x1fa   :  { %v447_v26 = vpop.f32.mrf.mxu0 }
 0x1fb   :  { %v448_v62 = vadd.f32 %v2552_v61, %v447_v26 }
 0x1fc   :  { %v877_v0 = vpop.f32.mrf.mxu1  ;;  %v1303_v1 = vpop.f32.mrf.mxu2 }
 0x1fd   :  { %v1826_v2 = vpop.eup %1825  ;;  %v545_v3 = vmax.f32 %v448_v62, 0.0  ;;  %v878_v4 = vadd.f32 %v2216_v36, %v877_v0  ;;  %v1304_v5 = vadd.f32 %v2385_v45, %v1303_v1  ;;  %v474_v62 = vpop.f32.mrf.mxu3  ;;  %v469_v0 = vadd.f32 %v2552_v61, %v468_v37 }
 0x1fe   :  { %1531 = vst.msk [vmem:[%s2925_s7 + $0x68] sm:$0xff] %vm1517_vm2, %v1826_v2  ;;  %v475_v7 = vadd.f32 %v2552_v61, %v474_v62 }
 0x1ff   :  { %v1007_v6 = vmax.f32 %v878_v4, 0.0  ;;  %1827 = vtanh.f32 %v1304_v5  ;;  %1697 = vmatmul.msk.f32.gmra.mxu1 %vm574_vm1, %v545_v3  ;;  %v552_v1 = vmax.f32 %v469_v0, 0.0 }
 0x201   :  { %1745 = vmatmul.msk.f32.gmra.mxu2 %vm574_vm1, %v1007_v6 }
 0x202   :  { %v450_v8 = vpop.f32.mrf.mxu0 }
 0x203   :  { %v451_v9 = vadd.f32 %v2552_v61, %v450_v8 }
 0x204   :  { %v880_v10 = vpop.f32.mrf.mxu1  ;;  %v1306_v12 = vpop.f32.mrf.mxu2 }
 0x205   :  { %v1828_v16 = vpop.eup %1827  ;;  %v546_v17 = vmax.f32 %v451_v9, 0.0  ;;  %v881_v18 = vadd.f32 %v2216_v36, %v880_v10  ;;  %v1307_v20 = vadd.f32 %v2385_v45, %v1306_v12  ;;  %v472_v9 = vadd.f32 %v2552_v61, %v471_v48  ;;  %v477_v10 = vpop.f32.mrf.mxu3 }
 0x206   :  { %1532 = vst.msk [vmem:[%s2925_s7 + $0x70] sm:$0xff] %vm1517_vm2, %v1828_v16  ;;  %v478_v30 = vadd.f32 %v2552_v61, %v477_v10 }
 0x207   :  { %v1008_v24 = vmax.f32 %v881_v18, 0.0  ;;  %1829 = vtanh.f32 %v1307_v20  ;;  %1698 = vmatmul.msk.f32.vlgmr.msrb.gmra.mxu3 %vm574_vm1, %v546_v17  ;;  %v553_v12 = vmax.f32 %v472_v9, 0.0 }
 0x209   :  { %1746 = vmatmul.msk.f32.gmra.mxu2 %vm574_vm1, %v1008_v24 }
 0x20c   :  { %v883_v11 = vpop.f32.mrf.mxu1  ;;  %v1309_v13 = vpop.f32.mrf.mxu2 }
 0x20d   :  { %v1830_v27 = vpop.eup %1829  ;;  %v884_v28 = vadd.f32 %v2216_v36, %v883_v11  ;;  %v1310_v14 = vadd.f32 %v2385_v45, %v1309_v13  ;;  %v554_v11 = vmax.f32 %v475_v7, 0.0 }
 0x20e   :  { %1533 = vst.msk [vmem:[%s2925_s7 + $0x78] sm:$0xff] %vm1517_vm2, %v1830_v27 }
 0x20f   :  { %v1009_v29 = vmax.f32 %v884_v28, 0.0  ;;  %1831 = vtanh.f32 %v1310_v14  ;;  %1699 = vmatmul.msk.f32.gmra.mxu3 %vm574_vm1, %v547_v25  ;;  %v480_v25 = vpop.f32.mrf.mxu3  ;;  %v2639_v28 = vld [vmem:[%s2922_s4] ss:$0 sm:$0xff] }
 0x210   :  { %v481_v37 = vadd.f32 %v2552_v61, %v480_v25 }
 0x211   :  { %1747 = vmatmul.msk.f32.gmra.mxu2 %vm574_vm1, %v1009_v29 }
 0x214   :  { %v886_v21 = vpop.f32.mrf.mxu1  ;;  %v1312_v31 = vpop.f32.mrf.mxu2 }
 0x215   :  { %v1832_v32 = vpop.eup %1831  ;;  %v887_v33 = vadd.f32 %v2216_v36, %v886_v21  ;;  %v1313_v34 = vadd.f32 %v2385_v45, %v1312_v31 }
 0x216   :  { %1534 = vst.msk [vmem:[%s2925_s7 + $0x80] sm:$0xff] %vm1517_vm2, %v1832_v32 }
 0x217   :  { %v1010_v22 = vmax.f32 %v887_v33, 0.0  ;;  %1833 = vtanh.f32 %v1313_v34  ;;  %1700 = vmatmul.msk.f32.gmra.mxu3 %vm574_vm1, %v548_v19  ;;  %v555_v19 = vmax.f32 %v478_v30, 0.0  ;;  %v483_v21 = vpop.f32.mrf.mxu3 }
 0x219   :  { %1748 = vmatmul.msk.f32.gmra.mxu2 %vm574_vm1, %v1010_v22 }
 0x21c   :  { %v889_v39 = vpop.f32.mrf.mxu1  ;;  %v1315_v40 = vpop.f32.mrf.mxu2 }
 0x21d   :  { %v1834_v41 = vpop.eup %1833  ;;  %v890_v42 = vadd.f32 %v2216_v36, %v889_v39  ;;  %v1316_v43 = vadd.f32 %v2385_v45, %v1315_v40 }
 0x21e   :  { %1535 = vst.msk [vmem:[%s2925_s7 + $0x88] sm:$0xff] %vm1517_vm2, %v1834_v41 }
 0x21f   :  { %v1011_v44 = vmax.f32 %v890_v42, 0.0  ;;  %1835 = vtanh.f32 %v1316_v43  ;;  %1701 = vmatmul.msk.f32.gmra.mxu3 %vm574_vm1, %v549_v38  ;;  %v556_v38 = vmax.f32 %v481_v37, 0.0 }
 0x221   :  { %1749 = vmatmul.msk.f32.gmra.mxu2 %vm574_vm1, %v1011_v44  ;;  %v486_v44 = vpop.f32.mrf.mxu3 }
 0x222   :  { %v487_v55 = vadd.f32 %v2552_v61, %v486_v44 }
 0x224   :  { %v892_v49 = vpop.f32.mrf.mxu1  ;;  %v1318_v50 = vpop.f32.mrf.mxu2 }
 0x225   :  { %v1836_v51 = vpop.eup %1835  ;;  %v893_v52 = vadd.f32 %v2216_v36, %v892_v49  ;;  %v1319_v53 = vadd.f32 %v2385_v45, %v1318_v50 }
 0x226   :  { %1536 = vst.msk [vmem:[%s2925_s7 + $0x90] sm:$0xff] %vm1517_vm2, %v1836_v51 }
 0x227   :  { %v1012_v54 = vmax.f32 %v893_v52, 0.0  ;;  %1837 = vtanh.f32 %v1319_v53  ;;  %1702 = vmatmul.msk.f32.gmra.mxu3 %vm574_vm1, %v550_v47  ;;  %v484_v47 = vadd.f32 %v2552_v61, %v483_v21 }
 0x229   :  { %1750 = vmatmul.msk.f32.gmra.mxu2 %vm574_vm1, %v1012_v54  ;;  %v557_v48 = vmax.f32 %v484_v47, 0.0 }
 0x22c   :  { %v895_v57 = vpop.f32.mrf.mxu1  ;;  %v1321_v58 = vpop.f32.mrf.mxu2 }
 0x22d   :  { %v1838_v59 = vpop.eup %1837  ;;  %v896_v60 = vadd.f32 %v2216_v36, %v895_v57  ;;  %v1322_v26 = vadd.f32 %v2385_v45, %v1321_v58  ;;  %v558_v57 = vmax.f32 %v487_v55, 0.0 }
 0x22e   :  { %1537 = vst.msk [vmem:[%s2925_s7 + $0x98] sm:$0xff] %vm1517_vm2, %v1838_v59 }
 0x22f   :  { %v1013_v63 = vmax.f32 %v896_v60, 0.0  ;;  %1839 = vtanh.f32 %v1322_v26  ;;  %1703 = vmatmul.msk.f32.gmra.mxu3 %vm574_vm1, %v551_v56  ;;  %v489_v56 = vpop.f32.mrf.mxu3 }
 0x230   :  { %v490_v0 = vadd.f32 %v2552_v61, %v489_v56 }
 0x231   :  { %1751 = vmatmul.msk.f32.gmra.mxu2 %vm574_vm1, %v1013_v63 }
 0x234   :  { %v898_v2 = vpop.f32.mrf.mxu1  ;;  %v1324_v3 = vpop.f32.mrf.mxu2 }
 0x235   :  { %v1840_v4 = vpop.eup %1839  ;;  %v899_v5 = vadd.f32 %v2216_v36, %v898_v2  ;;  %v1325_v6 = vadd.f32 %v2385_v45, %v1324_v3  ;;  %v559_v2 = vmax.f32 %v490_v0, 0.0 }
 0x236   :  { %1538 = vst.msk [vmem:[%s2925_s7 + $0xa0] sm:$0xff] %vm1517_vm2, %v1840_v4 }
 0x237   :  { %v1014_v8 = vmax.f32 %v899_v5, 0.0  ;;  %1841 = vtanh.f32 %v1325_v6  ;;  %1704 = vmatmul.msk.f32.gmra.mxu3 %vm574_vm1, %v552_v1  ;;  %v492_v1 = vpop.f32.mrf.mxu3 }
 0x238   :  { %v493_v10 = vadd.f32 %v2552_v61, %v492_v1 }
 0x239   :  { %1752 = vmatmul.msk.f32.gmra.mxu2 %vm574_vm1, %v1014_v8 }
 0x23c   :  { %v901_v16 = vpop.f32.mrf.mxu1  ;;  %v1327_v17 = vpop.f32.mrf.mxu2 }
 0x23d   :  { %v1842_v18 = vpop.eup %1841  ;;  %v902_v20 = vadd.f32 %v2216_v36, %v901_v16  ;;  %v1328_v23 = vadd.f32 %v2385_v45, %v1327_v17 }
 0x23e   :  { %1539 = vst.msk [vmem:[%s2925_s7 + $0xa8] sm:$0xff] %vm1517_vm2, %v1842_v18 }
 0x23f   :  { %v1015_v24 = vmax.f32 %v902_v20, 0.0  ;;  %1843 = vtanh.f32 %v1328_v23  ;;  %1705 = vmatmul.msk.f32.gmra.mxu3 %vm574_vm1, %v553_v12  ;;  %v560_v12 = vmax.f32 %v493_v10, 0.0  ;;  %v495_v16 = vpop.f32.mrf.mxu3 }
 0x240   :  { %v496_v25 = vadd.f32 %v2552_v61, %v495_v16 }
 0x241   :  { %1753 = vmatmul.msk.f32.gmra.mxu2 %vm574_vm1, %v1015_v24 }
 0x244   :  { %v904_v13 = vpop.f32.mrf.mxu1  ;;  %v1330_v27 = vpop.f32.mrf.mxu2 }
 0x245   :  { %v1844_v36 = vpop.eup %1843  ;;  %v905_v14 = vadd.f32 %v2639_v28, %v904_v13  ;;  %v1331_v29 = vadd.f32 %v2385_v45, %v1330_v27 }
 0x246   :  { %1540 = vst.msk [vmem:[%s2925_s7 + $0xb0] sm:$0xff] %vm1517_vm2, %v1844_v36 }
 0x247   :  { %v1016_v15 = vmax.f32 %v905_v14, 0.0  ;;  %1845 = vtanh.f32 %v1331_v29  ;;  %1706 = vmatmul.msk.f32.gmra.mxu3 %vm574_vm1, %v554_v11  ;;  %v561_v11 = vmax.f32 %v496_v25, 0.0 }
 0x249   :  { %1754 = vmatmul.msk.f32.gmra.mxu2 %vm574_vm1, %v1016_v15 }
 0x24c   :  { %v907_v31 = vpop.f32.mrf.mxu1  ;;  %v1333_v32 = vpop.f32.mrf.mxu2 }
 0x24d   :  { %v1846_v33 = vpop.eup %1845  ;;  %v908_v34 = vadd.f32 %v2639_v28, %v907_v31  ;;  %v1334_v22 = vadd.f32 %v2385_v45, %v1333_v32 }
 0x24e   :  { %1541 = vst.msk [vmem:[%s2925_s7 + $0xb8] sm:$0xff] %vm1517_vm2, %v1846_v33 }
 0x24f   :  { %v1017_v35 = vmax.f32 %v908_v34, 0.0  ;;  %1847 = vtanh.f32 %v1334_v22  ;;  %1707 = vmatmul.msk.f32.gmra.mxu3 %vm574_vm1, %v555_v19 }
 0x251   :  { %1755 = vmatmul.msk.f32.gmra.mxu2 %vm574_vm1, %v1017_v35 }
 0x254   :  { %v910_v39 = vpop.f32.mrf.mxu1  ;;  %v1336_v40 = vpop.f32.mrf.mxu2 }
 0x255   :  { %v1848_v41 = vpop.eup %1847  ;;  %v911_v42 = vadd.f32 %v2639_v28, %v910_v39  ;;  %v1337_v43 = vadd.f32 %v2385_v45, %v1336_v40 }
 0x256   :  { %1542 = vst.msk [vmem:[%s2925_s7 + $0xc0] sm:$0xff] %vm1517_vm2, %v1848_v41 }
 0x257   :  { %v1018_v46 = vmax.f32 %v911_v42, 0.0  ;;  %1849 = vtanh.f32 %v1337_v43  ;;  %1708 = vmatmul.msk.f32.gmra.mxu3 %vm574_vm1, %v556_v38 }
 0x259   :  { %1756 = vmatmul.msk.f32.gmra.mxu2 %vm574_vm1, %v1018_v46 }
 0x25c   :  { %v913_v49 = vpop.f32.mrf.mxu1  ;;  %v1339_v50 = vpop.f32.mrf.mxu2 }
 0x25d   :  { %v1850_v51 = vpop.eup %1849  ;;  %v914_v52 = vadd.f32 %v2639_v28, %v913_v49  ;;  %v1340_v53 = vadd.f32 %v2385_v45, %v1339_v50 }
 0x25e   :  { %1543 = vst.msk [vmem:[%s2925_s7 + $0xc8] sm:$0xff] %vm1517_vm2, %v1850_v51 }
 0x25f   :  { %v1019_v54 = vmax.f32 %v914_v52, 0.0  ;;  %1851 = vtanh.f32 %v1340_v53  ;;  %1709 = vmatmul.msk.f32.gmra.mxu3 %vm574_vm1, %v557_v48 }
 0x261   :  { %1757 = vmatmul.msk.f32.gmra.mxu2 %vm574_vm1, %v1019_v54 }
 0x264   :  { %v916_v58 = vpop.f32.mrf.mxu1  ;;  %v1342_v59 = vpop.f32.mrf.mxu2 }
 0x265   :  { %v1852_v60 = vpop.eup %1851  ;;  %v917_v26 = vadd.f32 %v2639_v28, %v916_v58  ;;  %v1343_v62 = vadd.f32 %v2385_v45, %v1342_v59 }
 0x266   :  { %1544 = vst.msk [vmem:[%s2925_s7 + $0xd0] sm:$0xff] %vm1517_vm2, %v1852_v60 }
 0x267   :  { %v1020_v63 = vmax.f32 %v917_v26, 0.0  ;;  %1853 = vtanh.f32 %v1343_v62  ;;  %1710 = vmatmul.msk.f32.gmra.mxu3 %vm574_vm1, %v558_v57 }
 0x269   :  { %1758 = vmatmul.msk.f32.gmra.mxu2 %vm574_vm1, %v1020_v63 }
 0x26c   :  { %v919_v3 = vpop.f32.mrf.mxu1  ;;  %v1345_v4 = vpop.f32.mrf.mxu2 }
 0x26d   :  { %v1854_v5 = vpop.eup %1853  ;;  %v920_v6 = vadd.f32 %v2639_v28, %v919_v3  ;;  %v1346_v8 = vadd.f32 %v2385_v45, %v1345_v4 }
 0x26e   :  { %1545 = vst.msk [vmem:[%s2925_s7 + $0xd8] sm:$0xff] %vm1517_vm2, %v1854_v5 }
 0x26f   :  { %v1021_v9 = vmax.f32 %v920_v6, 0.0  ;;  %1855 = vtanh.f32 %v1346_v8  ;;  %1711 = vmatmul.msk.f32.gmra.mxu3 %vm574_vm1, %v559_v2 }
 0x271   :  { %1759 = vmatmul.msk.f32.gmra.mxu2 %vm574_vm1, %v1021_v9 }
 0x274   :  { %v922_v17 = vpop.f32.mrf.mxu1  ;;  %v1348_v18 = vpop.f32.mrf.mxu2 }
 0x275   :  { %v1856_v20 = vpop.eup %1855  ;;  %v923_v23 = vadd.f32 %v2639_v28, %v922_v17  ;;  %v1349_v24 = vadd.f32 %v2385_v45, %v1348_v18 }
 0x276   :  { %1546 = vst.msk [vmem:[%s2925_s7 + $0xe0] sm:$0xff] %vm1517_vm2, %v1856_v20 }
 0x277   :  { %v1022_v7 = vmax.f32 %v923_v23, 0.0  ;;  %1857 = vtanh.f32 %v1349_v24  ;;  %1712 = vmatmul.msk.f32.gmra.mxu3 %vm574_vm1, %v560_v12 }
 0x279   :  { %1760 = vmatmul.msk.f32.gmra.mxu2 %vm574_vm1, %v1022_v7 }
 0x27c   :  { %v925_v13 = vpop.f32.mrf.mxu1  ;;  %v1351_v27 = vpop.f32.mrf.mxu2 }
 0x27d   :  { %v1858_v36 = vpop.eup %1857  ;;  %v926_v14 = vadd.f32 %v2639_v28, %v925_v13  ;;  %v1352_v29 = vadd.f32 %v2385_v45, %v1351_v27 }
 0x27e   :  { %1547 = vst.msk [vmem:[%s2925_s7 + $0xe8] sm:$0xff] %vm1517_vm2, %v1858_v36 }
 0x27f   :  { %v1023_v15 = vmax.f32 %v926_v14, 0.0  ;;  %1859 = vtanh.f32 %v1352_v29  ;;  %1713 = vmatmul.msk.f32.gmra.mxu3 %vm574_vm1, %v561_v11 }
 0x281   :  { %1761 = vmatmul.msk.f32.gmra.mxu2 %vm574_vm1, %v1023_v15 }
 0x284   :  { %v1354_v61 = vpop.f32.mrf.mxu2 }
 0x285   :  { %v1860_v30 = vpop.eup %1859  ;;  %v1355_v19 = vadd.f32 %v2385_v45, %v1354_v61  ;;  %v2784_v61 = vld [vmem:[%s2924_s6] ss:$0 sm:$0xff] }
 0x286   :  { %1548 = vst.msk [vmem:[%s2925_s7 + $0xf0] sm:$0xff] %vm1517_vm2, %v1860_v30 }
 0x287   :  { %1861 = vtanh.f32 %v1355_v19 }
 0x28a   :  { %v928_v21 = vpop.f32.mrf.mxu3 }
 0x28b   :  { %v929_v31 = vadd.f32 %v2639_v28, %v928_v21 }
 0x28c   :  { %v1357_v32 = vpop.f32.mrf.mxu2 }
 0x28d   :  { %v1862_v33 = vpop.eup %1861  ;;  %v1024_v34 = vmax.f32 %v929_v31, 0.0  ;;  %v1358_v22 = vadd.f32 %v2385_v45, %v1357_v32 }
 0x28e   :  { %1549 = vst.msk [vmem:[%s2925_s7 + $0xf8] sm:$0xff] %vm1517_vm2, %v1862_v33 }
 0x28f   :  { %1863 = vtanh.f32 %v1358_v22  ;;  %1762 = vmatmul.msk.f32.vlgmr.msra.gmra.mxu3 %vm574_vm1, %v1024_v34 }
 0x292   :  { %v931_v35 = vpop.f32.mrf.mxu3 }
 0x293   :  { %v932_v37 = vadd.f32 %v2639_v28, %v931_v35 }
 0x294   :  { %v1360_v38 = vpop.f32.mrf.mxu2 }
 0x295   :  { %v1864_v39 = vpop.eup %1863  ;;  %v1025_v40 = vmax.f32 %v932_v37, 0.0  ;;  %v1361_v41 = vadd.f32 %v2385_v45, %v1360_v38 }
 0x296   :  { %1550 = vst.msk [vmem:[%s2925_s7 + $0x100] sm:$0xff] %vm1517_vm2, %v1864_v39 }
 0x297   :  { %1865 = vtanh.f32 %v1361_v41  ;;  %1763 = vmatmul.msk.f32.gmra.mxu3 %vm574_vm1, %v1025_v40 }
 0x29a   :  { %v934_v42 = vpop.f32.mrf.mxu3 }
 0x29b   :  { %v935_v43 = vadd.f32 %v2639_v28, %v934_v42 }
 0x29c   :  { %v1363_v44 = vpop.f32.mrf.mxu2 }
 0x29d   :  { %v1866_v46 = vpop.eup %1865  ;;  %v1026_v47 = vmax.f32 %v935_v43, 0.0  ;;  %v1364_v48 = vadd.f32 %v2385_v45, %v1363_v44 }
 0x29e   :  { %1551 = vst.msk [vmem:[%s2925_s7 + $0x108] sm:$0xff] %vm1517_vm2, %v1866_v46 }
 0x29f   :  { %1867 = vtanh.f32 %v1364_v48  ;;  %1764 = vmatmul.msk.f32.gmra.mxu3 %vm574_vm1, %v1026_v47 }
 0x2a2   :  { %v937_v49 = vpop.f32.mrf.mxu3 }
 0x2a3   :  { %v938_v50 = vadd.f32 %v2639_v28, %v937_v49 }
 0x2a4   :  { %v1366_v51 = vpop.f32.mrf.mxu2 }
 0x2a5   :  { %v1868_v52 = vpop.eup %1867  ;;  %v1027_v53 = vmax.f32 %v938_v50, 0.0  ;;  %v1367_v54 = vadd.f32 %v2385_v45, %v1366_v51 }
 0x2a6   :  { %1552 = vst.msk [vmem:[%s2925_s7 + $0x110] sm:$0xff] %vm1517_vm2, %v1868_v52 }
 0x2a7   :  { %1869 = vtanh.f32 %v1367_v54  ;;  %1765 = vmatmul.msk.f32.gmra.mxu3 %vm574_vm1, %v1027_v53 }
 0x2aa   :  { %v940_v55 = vpop.f32.mrf.mxu3 }
 0x2ab   :  { %v941_v56 = vadd.f32 %v2639_v28, %v940_v55 }
 0x2ac   :  { %v1369_v57 = vpop.f32.mrf.mxu2 }
 0x2ad   :  { %v1870_v58 = vpop.eup %1869  ;;  %v1028_v59 = vmax.f32 %v941_v56, 0.0  ;;  %v1370_v60 = vadd.f32 %v2385_v45, %v1369_v57 }
 0x2ae   :  { %1553 = vst.msk [vmem:[%s2925_s7 + $0x118] sm:$0xff] %vm1517_vm2, %v1870_v58 }
 0x2af   :  { %1871 = vtanh.f32 %v1370_v60  ;;  %1766 = vmatmul.msk.f32.gmra.mxu3 %vm574_vm1, %v1028_v59 }
 0x2b2   :  { %v943_v26 = vpop.f32.mrf.mxu3 }
 0x2b3   :  { %v944_v62 = vadd.f32 %v2639_v28, %v943_v26 }
 0x2b4   :  { %v1372_v63 = vpop.f32.mrf.mxu2 }
 0x2b5   :  { %v1872_v0 = vpop.eup %1871  ;;  %v1029_v1 = vmax.f32 %v944_v62, 0.0  ;;  %v1373_v2 = vadd.f32 %v2385_v45, %v1372_v63 }
 0x2b6   :  { %1554 = vst.msk [vmem:[%s2925_s7 + $0x120] sm:$0xff] %vm1517_vm2, %v1872_v0 }
 0x2b7   :  { %1873 = vtanh.f32 %v1373_v2  ;;  %1767 = vmatmul.msk.f32.gmra.mxu3 %vm574_vm1, %v1029_v1 }
 0x2ba   :  { %v946_v3 = vpop.f32.mrf.mxu3 }
 0x2bb   :  { %v947_v4 = vadd.f32 %v2639_v28, %v946_v3 }
 0x2bc   :  { %v1375_v5 = vpop.f32.mrf.mxu2 }
 0x2bd   :  { %v1874_v6 = vpop.eup %1873  ;;  %v1030_v8 = vmax.f32 %v947_v4, 0.0  ;;  %v1376_v9 = vadd.f32 %v2385_v45, %v1375_v5 }
 0x2be   :  { %1555 = vst.msk [vmem:[%s2925_s7 + $0x128] sm:$0xff] %vm1517_vm2, %v1874_v6 }
 0x2bf   :  { %1875 = vtanh.f32 %v1376_v9  ;;  %1768 = vmatmul.msk.f32.gmra.mxu3 %vm574_vm1, %v1030_v8 }
 0x2c2   :  { %v949_v10 = vpop.f32.mrf.mxu3 }
 0x2c3   :  { %v950_v12 = vadd.f32 %v2639_v28, %v949_v10 }
 0x2c4   :  { %v1378_v16 = vpop.f32.mrf.mxu2 }
 0x2c5   :  { %v1876_v17 = vpop.eup %1875  ;;  %v1031_v18 = vmax.f32 %v950_v12, 0.0  ;;  %v1379_v20 = vadd.f32 %v2385_v45, %v1378_v16 }
 0x2c6   :  { %1556 = vst.msk [vmem:[%s2925_s7 + $0x130] sm:$0xff] %vm1517_vm2, %v1876_v17 }
 0x2c7   :  { %1877 = vtanh.f32 %v1379_v20  ;;  %1769 = vmatmul.msk.f32.gmra.mxu3 %vm574_vm1, %v1031_v18 }
 0x2ca   :  { %v952_v23 = vpop.f32.mrf.mxu3 }
 0x2cb   :  { %v953_v24 = vadd.f32 %v2639_v28, %v952_v23 }
 0x2cc   :  { %v1381_v7 = vpop.f32.mrf.mxu2 }
 0x2cd   :  { %v1878_v25 = vpop.eup %1877  ;;  %v1032_v11 = vmax.f32 %v953_v24, 0.0  ;;  %v1382_v13 = vadd.f32 %v2385_v45, %v1381_v7 }
 0x2ce   :  { %1557 = vst.msk [vmem:[%s2925_s7 + $0x138] sm:$0xff] %vm1517_vm2, %v1878_v25 }
 0x2cf   :  { %1879 = vtanh.f32 %v1382_v13  ;;  %1770 = vmatmul.msk.f32.gmra.mxu3 %vm574_vm1, %v1032_v11 }
 0x2d2   :  { %v955_v27 = vpop.f32.mrf.mxu3 }
 0x2d3   :  { %v956_v36 = vadd.f32 %v2639_v28, %v955_v27 }
 0x2d4   :  { %v1384_v14 = vpop.f32.mrf.mxu2 }
 0x2d5   :  { %v1880_v29 = vpop.eup %1879  ;;  %v1033_v15 = vmax.f32 %v956_v36, 0.0  ;;  %v1385_v45 = vadd.f32 %v2784_v61, %v1384_v14 }
 0x2d6   :  { %1558 = vst.msk [vmem:[%s2925_s7 + $0x140] sm:$0xff] %vm1517_vm2, %v1880_v29 }
 0x2d7   :  { %1881 = vtanh.f32 %v1385_v45  ;;  %1771 = vmatmul.msk.f32.gmra.mxu3 %vm574_vm1, %v1033_v15 }
 0x2da   :  { %v958_v30 = vpop.f32.mrf.mxu3 }
 0x2db   :  { %v959_v19 = vadd.f32 %v2639_v28, %v958_v30 }
 0x2dc   :  { %v1387_v21 = vpop.f32.mrf.mxu2 }
 0x2dd   :  { %v1882_v31 = vpop.eup %1881  ;;  %v1034_v32 = vmax.f32 %v959_v19, 0.0  ;;  %v1388_v33 = vadd.f32 %v2784_v61, %v1387_v21 }
 0x2de   :  { %1559 = vst.msk [vmem:[%s2925_s7 + $0x148] sm:$0xff] %vm1517_vm2, %v1882_v31 }
 0x2df   :  { %1883 = vtanh.f32 %v1388_v33  ;;  %1772 = vmatmul.msk.f32.gmra.mxu3 %vm574_vm1, %v1034_v32 }
 0x2e2   :  { %v961_v34 = vpop.f32.mrf.mxu3 }
 0x2e3   :  { %v962_v22 = vadd.f32 %v2639_v28, %v961_v34 }
 0x2e4   :  { %v1390_v35 = vpop.f32.mrf.mxu2 }
 0x2e5   :  { %v1884_v37 = vpop.eup %1883  ;;  %v1035_v38 = vmax.f32 %v962_v22, 0.0  ;;  %v1391_v39 = vadd.f32 %v2784_v61, %v1390_v35 }
 0x2e6   :  { %1560 = vst.msk [vmem:[%s2925_s7 + $0x150] sm:$0xff] %vm1517_vm2, %v1884_v37 }
 0x2e7   :  { %1885 = vtanh.f32 %v1391_v39  ;;  %1773 = vmatmul.msk.f32.gmra.mxu3 %vm574_vm1, %v1035_v38 }
 0x2ea   :  { %v964_v40 = vpop.f32.mrf.mxu3 }
 0x2eb   :  { %v965_v41 = vadd.f32 %v2639_v28, %v964_v40 }
 0x2ec   :  { %v1393_v42 = vpop.f32.mrf.mxu2 }
 0x2ed   :  { %v1886_v43 = vpop.eup %1885  ;;  %v1036_v44 = vmax.f32 %v965_v41, 0.0  ;;  %v1394_v46 = vadd.f32 %v2784_v61, %v1393_v42 }
 0x2ee   :  { %1561 = vst.msk [vmem:[%s2925_s7 + $0x158] sm:$0xff] %vm1517_vm2, %v1886_v43 }
 0x2ef   :  { %1887 = vtanh.f32 %v1394_v46  ;;  %1774 = vmatmul.msk.f32.gmra.mxu3 %vm574_vm1, %v1036_v44 }
 0x2f2   :  { %v967_v47 = vpop.f32.mrf.mxu3 }
 0x2f3   :  { %v968_v48 = vadd.f32 %v2639_v28, %v967_v47 }
 0x2f4   :  { %v1396_v49 = vpop.f32.mrf.mxu2 }
 0x2f5   :  { %v1888_v50 = vpop.eup %1887  ;;  %v1037_v51 = vmax.f32 %v968_v48, 0.0  ;;  %v1397_v52 = vadd.f32 %v2784_v61, %v1396_v49 }
 0x2f6   :  { %1562 = vst.msk [vmem:[%s2925_s7 + $0x160] sm:$0xff] %vm1517_vm2, %v1888_v50 }
 0x2f7   :  { %1889 = vtanh.f32 %v1397_v52  ;;  %1775 = vmatmul.msk.f32.gmra.mxu3 %vm574_vm1, %v1037_v51 }
 0x2fa   :  { %v970_v53 = vpop.f32.mrf.mxu3 }
 0x2fb   :  { %v971_v54 = vadd.f32 %v2639_v28, %v970_v53 }
 0x2fc   :  { %v1399_v55 = vpop.f32.mrf.mxu2 }
 0x2fd   :  { %v1890_v56 = vpop.eup %1889  ;;  %v1038_v57 = vmax.f32 %v971_v54, 0.0  ;;  %v1400_v58 = vadd.f32 %v2784_v61, %v1399_v55 }
 0x2fe   :  { %1563 = vst.msk [vmem:[%s2925_s7 + $0x168] sm:$0xff] %vm1517_vm2, %v1890_v56 }
 0x2ff   :  { %1891 = vtanh.f32 %v1400_v58  ;;  %1776 = vmatmul.msk.f32.gmra.mxu3 %vm574_vm1, %v1038_v57 }
 0x302   :  { %v973_v59 = vpop.f32.mrf.mxu3 }
 0x303   :  { %v974_v60 = vadd.f32 %v2639_v28, %v973_v59 }
 0x304   :  { %v1402_v26 = vpop.f32.mrf.mxu2 }
 0x305   :  { %v1892_v62 = vpop.eup %1891  ;;  %v1039_v63 = vmax.f32 %v974_v60, 0.0  ;;  %v1403_v0 = vadd.f32 %v2784_v61, %v1402_v26 }
 0x306   :  { %1564 = vst.msk [vmem:[%s2925_s7 + $0x170] sm:$0xff] %vm1517_vm2, %v1892_v62 }
 0x307   :  { %1893 = vtanh.f32 %v1403_v0  ;;  %1777 = vmatmul.msk.f32.gmra.mxu3 %vm574_vm1, %v1039_v63 }
 0x30d   :  { %v1894_v1 = vpop.eup %1893 }
 0x30e   :  { %1565 = vst.msk [vmem:[%s2925_s7 + $0x178] sm:$0xff] %vm1517_vm2, %v1894_v1 }
 0x312   :  { %v1405_v28 = vpop.f32.mrf.mxu3 }
 0x313   :  { %v1406_v2 = vadd.f32 %v2784_v61, %v1405_v28 }
 0x315   :  { %1895 = vtanh.f32 %v1406_v2 }
 0x31a   :  { %v1408_v3 = vpop.f32.mrf.mxu3 }
 0x31b   :  { %v1896_v4 = vpop.eup %1895  ;;  %v1409_v5 = vadd.f32 %v2784_v61, %v1408_v3 }
 0x31c   :  { %1566 = vst.msk [vmem:[%s2925_s7 + $0x180] sm:$0xff] %vm1517_vm2, %v1896_v4 }
 0x31d   :  { %1897 = vtanh.f32 %v1409_v5 }
 0x322   :  { %v1411_v6 = vpop.f32.mrf.mxu3 }
 0x323   :  { %v1898_v8 = vpop.eup %1897  ;;  %v1412_v9 = vadd.f32 %v2784_v61, %v1411_v6 }
 0x324   :  { %1567 = vst.msk [vmem:[%s2925_s7 + $0x188] sm:$0xff] %vm1517_vm2, %v1898_v8 }
 0x325   :  { %1899 = vtanh.f32 %v1412_v9 }
 0x32a   :  { %v1414_v10 = vpop.f32.mrf.mxu3 }
 0x32b   :  { %v1900_v12 = vpop.eup %1899  ;;  %v1415_v16 = vadd.f32 %v2784_v61, %v1414_v10 }
 0x32c   :  { %1568 = vst.msk [vmem:[%s2925_s7 + $0x190] sm:$0xff] %vm1517_vm2, %v1900_v12 }
 0x32d   :  { %1901 = vtanh.f32 %v1415_v16 }
 0x332   :  { %v1417_v17 = vpop.f32.mrf.mxu3 }
 0x333   :  { %v1902_v18 = vpop.eup %1901  ;;  %v1418_v20 = vadd.f32 %v2784_v61, %v1417_v17 }
 0x334   :  { %1569 = vst.msk [vmem:[%s2925_s7 + $0x198] sm:$0xff] %vm1517_vm2, %v1902_v18 }
 0x335   :  { %1903 = vtanh.f32 %v1418_v20 }
 0x33a   :  { %v1420_v23 = vpop.f32.mrf.mxu3 }
 0x33b   :  { %v1904_v24 = vpop.eup %1903  ;;  %v1421_v7 = vadd.f32 %v2784_v61, %v1420_v23 }
 0x33c   :  { %1570 = vst.msk [vmem:[%s2925_s7 + $0x1a0] sm:$0xff] %vm1517_vm2, %v1904_v24 }
 0x33d   :  { %1905 = vtanh.f32 %v1421_v7 }
 0x342   :  { %v1423_v25 = vpop.f32.mrf.mxu3 }
 0x343   :  { %v1906_v11 = vpop.eup %1905  ;;  %v1424_v13 = vadd.f32 %v2784_v61, %v1423_v25 }
 0x344   :  { %1571 = vst.msk [vmem:[%s2925_s7 + $0x1a8] sm:$0xff] %vm1517_vm2, %v1906_v11 }
 0x345   :  { %1907 = vtanh.f32 %v1424_v13 }
 0x34a   :  { %v1426_v27 = vpop.f32.mrf.mxu3 }
 0x34b   :  { %v1908_v36 = vpop.eup %1907  ;;  %v1427_v14 = vadd.f32 %v2784_v61, %v1426_v27 }
 0x34c   :  { %1572 = vst.msk [vmem:[%s2925_s7 + $0x1b0] sm:$0xff] %vm1517_vm2, %v1908_v36 }
 0x34d   :  { %1909 = vtanh.f32 %v1427_v14 }
 0x352   :  { %v1429_v29 = vpop.f32.mrf.mxu3 }
 0x353   :  { %v1910_v15 = vpop.eup %1909  ;;  %v1430_v45 = vadd.f32 %v2784_v61, %v1429_v29 }
 0x354   :  { %1573 = vst.msk [vmem:[%s2925_s7 + $0x1b8] sm:$0xff] %vm1517_vm2, %v1910_v15 }
 0x355   :  { %1911 = vtanh.f32 %v1430_v45 }
 0x35a   :  { %v1432_v30 = vpop.f32.mrf.mxu3 }
 0x35b   :  { %v1912_v19 = vpop.eup %1911  ;;  %v1433_v21 = vadd.f32 %v2784_v61, %v1432_v30 }
 0x35c   :  { %1574 = vst.msk [vmem:[%s2925_s7 + $0x1c0] sm:$0xff] %vm1517_vm2, %v1912_v19 }
 0x35d   :  { %1913 = vtanh.f32 %v1433_v21 }
 0x362   :  { %v1435_v31 = vpop.f32.mrf.mxu3 }
 0x363   :  { %v1914_v32 = vpop.eup %1913  ;;  %v1436_v33 = vadd.f32 %v2784_v61, %v1435_v31 }
 0x364   :  { %1575 = vst.msk [vmem:[%s2925_s7 + $0x1c8] sm:$0xff] %vm1517_vm2, %v1914_v32 }
 0x365   :  { %1915 = vtanh.f32 %v1436_v33 }
 0x36a   :  { %v1438_v34 = vpop.f32.mrf.mxu3 }
 0x36b   :  { %v1916_v22 = vpop.eup %1915  ;;  %v1439_v35 = vadd.f32 %v2784_v61, %v1438_v34 }
 0x36c   :  { %1576 = vst.msk [vmem:[%s2925_s7 + $0x1d0] sm:$0xff] %vm1517_vm2, %v1916_v22 }
 0x36d   :  { %1917 = vtanh.f32 %v1439_v35 }
 0x372   :  { %v1441_v37 = vpop.f32.mrf.mxu3 }
 0x373   :  { %v1918_v38 = vpop.eup %1917  ;;  %v1442_v39 = vadd.f32 %v2784_v61, %v1441_v37 }
 0x374   :  { %1577 = vst.msk [vmem:[%s2925_s7 + $0x1d8] sm:$0xff] %vm1517_vm2, %v1918_v38 }
 0x375   :  { %1919 = vtanh.f32 %v1442_v39 }
 0x37a   :  { %v1444_v40 = vpop.f32.mrf.mxu3 }
 0x37b   :  { %v1920_v41 = vpop.eup %1919  ;;  %v1445_v42 = vadd.f32 %v2784_v61, %v1444_v40 }
 0x37c   :  { %1578 = vst.msk [vmem:[%s2925_s7 + $0x1e0] sm:$0xff] %vm1517_vm2, %v1920_v41 }
 0x37d   :  { %1921 = vtanh.f32 %v1445_v42 }
 0x382   :  { %v1447_v43 = vpop.f32.mrf.mxu3 }
 0x383   :  { %v1922_v44 = vpop.eup %1921  ;;  %v1448_v46 = vadd.f32 %v2784_v61, %v1447_v43 }
 0x384   :  { %1579 = vst.msk [vmem:[%s2925_s7 + $0x1e8] sm:$0xff] %vm1517_vm2, %v1922_v44 }
 0x385   :  { %1923 = vtanh.f32 %v1448_v46 }
 0x38a   :  { %v1450_v47 = vpop.f32.mrf.mxu3 }
 0x38b   :  { %v1924_v48 = vpop.eup %1923  ;;  %v1451_v49 = vadd.f32 %v2784_v61, %v1450_v47 }
 0x38c   :  { %1580 = vst.msk [vmem:[%s2925_s7 + $0x1f0] sm:$0xff] %vm1517_vm2, %v1924_v48 }
 0x38d   :  { %1925 = vtanh.f32 %v1451_v49 }
 0x393   :  { %v1926_v50 = vpop.eup %1925 }
 0x394   :  { %1581 = vst.msk [vmem:[%s2925_s7 + $0x1f8] sm:$0xff] %vm1517_vm2, %v1926_v50 }

</bundles_post_ra>
